<compile_context>
chip_gen: v7x
topology: tpu7x:2x2x1
jax: 0.10.0
libtpu: 0.0.40
codegen_flags: <defaults>
</compile_context>

<pallas_src>
import jax
import jax.numpy as jnp
from jax.experimental import pallas as pl
from jax.experimental.pallas import tpu as pltpu

_LANES = 128
_SUBLANES = 8
_TILE_BYTES = 2 * 1024 * 1024   # ~MiB-scale tiles sit at ~85% of HBM roofline
_SMALL_F_MAX = 32               # packed / MXU path for F <= 32 (Iris: F = 4)


def _round_down(v, m):
    return max(m, (v // m) * m)


def _pick_tile(rows, row_bytes, target_bytes, min_rows):
    """Byte-sized row tile: a multiple of `min_rows` (or == rows), and capped so
    the grid has >= 2 steps when there is enough work (v7x has 2 TensorCores)."""
    t = max(min_rows, target_bytes // max(row_bytes, 1))
    t = min(t, rows)
    if t < rows:
        t = _round_down(t, min_rows)
    elif rows >= 2 * min_rows:          # single full-size step -> split in two
        t = _round_down(pl.cdiv(rows, 2), min_rows)
    return t


# -------------------- small-F path: packed rows + MXU ------------------------

def _packed_kernel(x_ref, w_ref, b_ref, o_ref):
    # x_ref: (TR, 128*F) -- 128 samples per row, fully lane-dense.
    # w_ref: (128*F, 128) block-diagonal weight (resident in VMEM).
    # b_ref: (1, 1) bias scalar in SMEM.
    z = jnp.dot(x_ref[...], w_ref[...],
                preferred_element_type=jnp.float32,
                precision=jax.lax.Precision.HIGHEST) + b_ref[0, 0]
    o_ref[...] = jax.nn.sigmoid(z).astype(o_ref.dtype)   # EUP exp + reciprocal


def _forward_packed(x, w_vec, b, tile_bytes):
    B, F = x.shape
    L = _LANES * F
    R = pl.cdiv(B, _LANES)
    Bp = R * _LANES

    if Bp != B:
        # <= 127 rows of zero padding; skipped (pure bitcast reshape) when B is
        # already 128-aligned, which is the recommended production layout.
        x = jnp.zeros((Bp, F), x.dtype).at[:B].set(x)
    xp = x.reshape(R, L)                 # free row-major view: 128 samples/row

    # Block-diagonal weight (L, 128): W[s*F + f, t] = w[f] iff s == t, so
    # (xp @ W)[r, t] = dot(x[r*128 + t, :], w).  Tiny and read once.
    s_idx = jnp.arange(L) // F
    f_idx = jnp.arange(L) % F
    w_bd = jnp.where(s_idx[:, None] == jnp.arange(_LANES)[None, :],
                     w_vec[f_idx][:, None], 0.0).astype(x.dtype)

    row_bytes = L * x.dtype.itemsize
    TR = _pick_tile(R, row_bytes, tile_bytes, _SUBLANES)
    grid = (pl.cdiv(R, TR),)

    # Double-buffered x + out streams plus the resident weight, with headroom.
    est = 2 * TR * row_bytes + 2 * TR * _LANES * 4 + 2 * L * _LANES * x.dtype.itemsize
    vmem_limit = int(min(max(2 * est + (4 << 20), 32 << 20), 64 << 20))

    out = pl.pallas_call(
        _packed_kernel,
        out_shape=jax.ShapeDtypeStruct((R, _LANES), jnp.float32),
        grid_spec=pl.GridSpec(
            grid=grid,
            in_specs=[
                pl.BlockSpec((TR, L), lambda i: (i, 0)),              # x tile (pipelined)
                pl.BlockSpec((L, _LANES), lambda i: (0, 0)),          # weight, resident
                pl.BlockSpec(memory_space=pltpu.MemorySpace.SMEM),    # bias scalar
            ],
            out_specs=pl.BlockSpec((TR, _LANES), lambda i: (i, 0)),   # lane-dense output
        ),
        compiler_params=pltpu.CompilerParams(
            dimension_semantics=("parallel",),
            vmem_limit_bytes=vmem_limit,
        ),
    )(xp, w_bd, b)

    return out.reshape(Bp, 1)[:B]


# -------------------- large-F path: natural layout + lane reduce -------------

def _natural_kernel(x_ref, w_ref, b_ref, o_ref):
    x = x_ref[...].astype(jnp.float32)            # (TB, F), features on lanes
    w = w_ref[...].astype(jnp.float32)            # (1, F), resident
    z = jnp.sum(x * w, axis=1, keepdims=True) + b_ref[0, 0]   # VPU mul + XLU reduce
    o_ref[...] = jax.nn.sigmoid(z).astype(o_ref.dtype)


def _forward_natural(x, w_vec, b, tile_bytes):
    B, F = x.shape
    w_row = w_vec.reshape(1, F)

    row_bytes = F * x.dtype.itemsize
    TB = _pick_tile(B, row_bytes, tile_bytes, _SUBLANES)
    grid = (pl.cdiv(B, TB),)

    est = 2 * TB * row_bytes + 2 * TB * _LANES * 4 + _SUBLANES * _LANES * 4
    vmem_limit = int(min(max(2 * est + (4 << 20), 32 << 20), 64 << 20))

    return pl.pallas_call(
        _natural_kernel,
        out_shape=jax.ShapeDtypeStruct((B, 1), jnp.float32),
        grid_spec=pl.GridSpec(
            grid=grid,
            in_specs=[
                pl.BlockSpec((TB, F), lambda i: (i, 0)),              # x tile (pipelined)
                pl.BlockSpec((1, F), lambda i: (0, 0)),               # weight row, resident
                pl.BlockSpec(memory_space=pltpu.MemorySpace.SMEM),    # bias scalar
            ],
            out_specs=pl.BlockSpec((TB, 1), lambda i: (i, 0)),
        ),
        compiler_params=pltpu.CompilerParams(
            dimension_semantics=("parallel",),
            vmem_limit_bytes=vmem_limit,
        ),
    )(x, w_row, b)


# -------------------- public wrapper -----------------------------------------

def simple_perceptron(x, weight, bias, *, tile_bytes=_TILE_BYTES, stream_dtype=None):
    """sigmoid(x @ weight.T + bias) == SimplePerceptron.forward.

    x: (B, F); weight: nn.Linear layout (1, F) (or (F,)/(F, 1)); bias: (1,).
    Returns (B, 1) float32.  `stream_dtype=jnp.bfloat16` halves HBM read bytes.
    """
    x = jnp.asarray(x)
    B, F = x.shape
    w_vec = jnp.asarray(weight, jnp.float32).reshape(-1)
    assert w_vec.shape[0] == F, "weight must have F = x.shape[1] elements"
    b = jnp.asarray(bias, jnp.float32).reshape(1, 1)

    if stream_dtype is not None:
        x = x.astype(stream_dtype)
    elif x.dtype.name not in ("float32", "bfloat16"):
        x = x.astype(jnp.float32)

    if F <= _SMALL_F_MAX:
        return _forward_packed(x, w_vec, b, tile_bytes)
    return _forward_natural(x, w_vec, b, tile_bytes)


def _reference(x, weight, bias):
    w = jnp.asarray(weight, jnp.float32).reshape(1, -1)
    b = jnp.asarray(bias, jnp.float32).reshape(1, 1)
    return jax.nn.sigmoid(jnp.sum(jnp.asarray(x, jnp.float32) * w,
                                  axis=1, keepdims=True) + b)


if __name__ == "__main__":
    # NOTE: at this demo scale (B=8) plain XLA is just as fast; the Pallas
    # kernel only pays off at production batch sizes.  We run it here purely
    # to validate correctness of the kernels.
    key = jax.random.PRNGKey(0)
    kx, kw, kb = jax.random.split(key, 3)

    # Iris-style shapes: batch=8 samples, input_size=4 features (nn.Linear(4, 1)).
    B, F = 8, 4
    x = jax.random.normal(kx, (B, F), dtype=jnp.float32)
    bound = 1.0 / (F ** 0.5)        # PyTorch-like uniform(-1/sqrt(F), 1/sqrt(F))
    w = jax.random.uniform(kw, (1, F), minval=-bound, maxval=bound, dtype=jnp.float32)
    b = jax.random.uniform(kb, (1,), minval=-bound, maxval=bound, dtype=jnp.float32)

    out = jax.block_until_ready(simple_perceptron(x, w, b))
    assert out.shape == (B, 1)
    assert jnp.allclose(out, _reference(x, w, b), atol=1e-5, rtol=1e-5)

    # Extra shape coverage: multi-step packed grid with a ragged last row-block,
    # and the natural-layout path (F > 32) with ragged batch tiles.
    for (Bt, Ft) in [(2080, 4), (300, 160)]:
        kx2, kw2, kb2 = jax.random.split(jax.random.PRNGKey(Bt + Ft), 3)
        xt = jax.random.normal(kx2, (Bt, Ft), dtype=jnp.float32)
        bd = 1.0 / (Ft ** 0.5)
        wt = jax.random.uniform(kw2, (1, Ft), minval=-bd, maxval=bd, dtype=jnp.float32)
        bt = jax.random.uniform(kb2, (1,), minval=-bd, maxval=bd, dtype=jnp.float32)
        ot = jax.block_until_ready(simple_perceptron(xt, wt, bt))
        assert ot.shape == (Bt, 1)
        assert jnp.allclose(ot, _reference(xt, wt, bt), atol=1e-5, rtol=1e-5)

    print("KERNEL_OK")
</pallas_src>

<mosaic_0001>
module attributes {stable_mosaic.version = 11 : i64} {
  func.func @_packed_kernel(%arg0: i32, %arg1: memref<1x512xf32, #tpu.memory_space<vmem>>, %arg2: memref<512x128xf32, #tpu.memory_space<vmem>>, %arg3: memref<1x1xf32, #tpu.memory_space<smem>>, %arg4: memref<1x128xf32, #tpu.memory_space<vmem>>) attributes {dimension_semantics = [#tpu.dimension_semantics<parallel>], iteration_bounds = array<i64: 1>, scalar_prefetch = 0 : i64, scratch_operands = 0 : i64, tpu.core_type = #tpu.core_type<tc>, window_params = [{transform_indices = @transform_0, window_bounds = array<i64: 1, 512>}, {pipeline_mode = #tpu.pipeline_mode<synchronous>, transform_indices = @transform_1, window_bounds = array<i64: 512, 128>}, {transform_indices = @transform_2, window_bounds = array<i64: 1, 1>}, {transform_indices = @transform_3, window_bounds = array<i64: 1, 128>}]} {
    %c0 = arith.constant 0 : index
    %c0_0 = arith.constant 0 : index
    %0 = vector.load %arg1[%c0, %c0_0] : memref<1x512xf32, #tpu.memory_space<vmem>>, vector<1x512xf32>
    %c0_1 = arith.constant 0 : index
    %c0_2 = arith.constant 0 : index
    %1 = vector.load %arg2[%c0_1, %c0_2] : memref<512x128xf32, #tpu.memory_space<vmem>>, vector<512x128xf32>
    %cst = arith.constant dense<0.000000e+00> : vector<1x128xf32>
    %2 = tpu.matmul %0, %1, %cst {dimension_numbers = #tpu.dot_dimension_numbers<[1], [0], [0], [1], [0, 0, 1, 1], [], []>, precision = #tpu.contract_precision<fp32>} : vector<1x512xf32>, vector<512x128xf32>, vector<1x128xf32> -> vector<1x128xf32>
    %c0_3 = arith.constant 0 : index
    %c0_4 = arith.constant 0 : index
    %3 = memref.load %arg3[%c0_3, %c0_4] : memref<1x1xf32, #tpu.memory_space<smem>>
    %4 = vector.broadcast %3 : f32 to vector<1x128xf32>
    %5 = arith.addf %2, %4 : vector<1x128xf32>
    %6 = arith.negf %5 : vector<1x128xf32>
    %7 = math.exp %6 : vector<1x128xf32>
    %cst_5 = arith.constant 1.000000e+00 : f32
    %8 = vector.broadcast %cst_5 : f32 to vector<1x128xf32>
    %9 = arith.addf %8, %7 : vector<1x128xf32>
    %10 = arith.divf %8, %9 : vector<1x128xf32>
    %c0_6 = arith.constant 0 : index
    %c0_7 = arith.constant 0 : index
    %11 = vector.load %arg4[%c0_6, %c0_7] : memref<1x128xf32, #tpu.memory_space<vmem>>, vector<1x128xf32>
    tpu.vector_store %arg4[%c0_6, %c0_7], %10 {strides = array<i32>} : memref<1x128xf32, #tpu.memory_space<vmem>>, vector<1x128xf32>,
    return
  }
  func.func @transform_0(%arg0: i32) -> (i32, i32) {
    %c0_i32 = arith.constant 0 : i32
    %c0_i32_0 = arith.constant 0 : i32
    return %arg0, %c0_i32 : i32, i32
  }
  func.func @transform_1(%arg0: i32) -> (i32, i32) {
    %c0_i32 = arith.constant 0 : i32
    %c0_i32_0 = arith.constant 0 : i32
    %c0_i32_1 = arith.constant 0 : i32
    return %c0_i32, %c0_i32_0 : i32, i32
  }
  func.func @transform_2(%arg0: i32) -> (i32, i32) {
    %c0_i32 = arith.constant 0 : i32
    %c0_i32_0 = arith.constant 0 : i32
    %c0_i32_1 = arith.constant 0 : i32
    return %c0_i32, %c0_i32_0 : i32, i32
  }
  func.func @transform_3(%arg0: i32) -> (i32, i32) {
    %c0_i32 = arith.constant 0 : i32
    %c0_i32_0 = arith.constant 0 : i32
    return %arg0, %c0_i32 : i32, i32
  }
}

</mosaic_0001>

<bundles_post_ra>
// kernel: tpu_custom_call.1
= control target key start
LH: loop header
LB: loop body
LE: loop exit
PB: predicated region body
PF: predicated region fallthrough
CT: control target
= control target key end

     0   :  { %9 = vsyncpa [#allocation4], 0  ;;  %s3744_s0 = inlined_call_operand.hbm [shape: f32[1,512], index: 0, kind: input, shape index: {}]   ;;  %s3745_s1 = inlined_call_operand.hbm [shape: f32[512,128], index: 1, kind: input, shape index: {}]   ;;  %s3746_s2 = inlined_call_operand.<no memory space> [shape: f32[1,1], index: 2, kind: input, shape index: {}]   ;;  %s3747_s3 = inlined_call_operand.hbm [shape: f32[1,128], index: 3, kind: output, shape index: {}]  }
   0x1   :  { %10 = vsyncpa [#allocation7], 0 }
   0x2   :  { %11 = vsyncpa [#allocation5], 0  ;;  %s2763_s12 = smov [#allocation3]   ;;  %s2764_s14 = smov [#allocation6]  }
   0x3   :  { %s18_s13 = sshll.u32 %s2763_s12, 4  ;;  %s27_s15 = sshll.u32 %s2764_s14, 4  ;;  %s19_s13 = int_to_ptr.vmem [resolvable:$true] %s18_s13  ;;  %s2788_s15 = int_to_ptr.vmem [resolvable:$true] %s27_s15 }
   0x4   :  { %s2691_s18 = scalar_lea.hbm %s3744_s0, 64 }
   0x5   :  { %p2692_p0 = scmp.ne.s32.totalorder %s3744_s0, %s2691_s18  ;;  %p2695_p1 = scmp.lt.u32.totalorder %s2691_s18, %s3744_s0 }
   0x7   :  { %p2697_p2 = pnand %p2695_p1, %p2692_p0 }
   0x9   :  { %2700 = shalt.err (!%p2697_p2)
}
   0xa   :  { %s2701_s23 = scalar_lea.vmem %s19_s13, 64  ;;  %p2706_p4 = scmp.lt.s32.totalorder %s19_s13, %s19_s13 }
   0xb   :  { %p2702_p3 = scmp.ne.s32.totalorder %s19_s13, %s2701_s23  ;;  %p2707_p5 = scmp.lt.s32.totalorder %s2701_s23, %s2701_s23 }
   0xd   :  { %p2708_p6 = por %p2707_p5, %p2706_p4 }
   0xf   :  { %p2709_p7 = pnand %p2708_p6, %p2702_p3 }
  0x11   :  { %2712 = shalt.err (!%p2709_p7)
}
  0x12   :  { %21 = dma.hbm_to_vmem [thread:$0]  %s3744_s0, 64, %s19_s13, [#allocation4]  }
  0x13   :  { %s2713_s28 = scalar_lea.hbm %s3745_s1, 8192 }
  0x14   :  { %p2714_p8 = scmp.ne.s32.totalorder %s3745_s1, %s2713_s28  ;;  %p2717_p9 = scmp.lt.u32.totalorder %s2713_s28, %s3745_s1 }
  0x16   :  { %p2719_p10 = pnand %p2717_p9, %p2714_p8 }
  0x18   :  { %2722 = shalt.err (!%p2719_p10)
}
  0x19   :  { %s2723_s6 = scalar_lea.vmem %s2788_s15, 8192  ;;  %p2728_p12 = scmp.lt.s32.totalorder %s2788_s15, %s2788_s15 }
  0x1a   :  { %p2724_p11 = scmp.ne.s32.totalorder %s2788_s15, %s2723_s6  ;;  %p2729_p13 = scmp.lt.s32.totalorder %s2723_s6, %s2723_s6 }
  0x1c   :  { %p2730_p0 = por %p2729_p13, %p2728_p12 }
  0x1e   :  { %p2731_p1 = pnand %p2730_p0, %p2724_p11 }
  0x20   :  { %2734 = shalt.err (!%p2731_p1)
}
  0x21   :  { %s2765_s0 = smov 128   ;;  %s2766_s7 = smov 8  }
  0x22   :  { %33 = dma.hbm_to_vmem [thread:$0]  %s3745_s1, 8192, %s2788_s15, [#allocation7], %s2765_s0, %s2765_s0, %s2766_s7  }
  0x23   :  { %2757 = dma.done.wait [#allocation4], 64  }
  0x24   :  { %2758 = vsyncadd [#allocation4], 4294967232 }
  0x25   :  { %2759 = dma.done.wait [#allocation7], 8192  }
  0x26   :  { %2760 = vsyncadd [#allocation7], 4294959104  ;;  %v110_v0 = vlaneseq  ;;  %v59_v2 = vld [vmem:[#allocation6 + $0x80] sm:$0xff]  ;;  %v60_v3 = vld [vmem:[#allocation6 + $0x88] sm:$0xff] }
  0x27   :  { %v43_v4 = vld [vmem:[#allocation6] sm:$0xff]  ;;  %v179_v5 = vand.u32 4294901760, %v59_v2  ;;  %v182_v6 = vand.u32 4294901760, %v60_v3  ;;  %v44_v7 = vld [vmem:[#allocation6 + $0x8] sm:$0xff]  ;;  %v61_v9 = vld [vmem:[#allocation6 + $0x90] sm:$0xff] }
  0x28   :  { %v2819_v1 = vshrl.u32 %v110_v0, 7  ;;  %v131_v8 = vand.u32 4294901760, %v43_v4  ;;  %v62_v10 = vld [vmem:[#allocation6 + $0x98] sm:$0xff]  ;;  %v134_v11 = vand.u32 4294901760, %v44_v7  ;;  %v185_v12 = vand.u32 4294901760, %v61_v9  ;;  %v45_v14 = vld [vmem:[#allocation6 + $0x10] sm:$0xff] }
  0x29   :  { %v188_v13 = vand.u32 4294901760, %v62_v10  ;;  %v46_v15 = vld [vmem:[#allocation6 + $0x18] sm:$0xff]  ;;  %v2822_v17 = vpack.c.bf16 %v182_v6, %v179_v5  ;;  %v137_v19 = vand.u32 4294901760, %v45_v14  ;;  %v63_v21 = vld [vmem:[#allocation6 + $0xa0] sm:$0xff]  ;;  %v64_v22 = vld [vmem:[#allocation6 + $0xa8] sm:$0xff]  ;;  %v2843_v35 = vsub.f32 %v59_v2, %v179_v5 }
  0x2a   :  { %3843 = vst [vmem:[#allocation12_spill] sm:$0xff] %v2819_v1  ;;  %v2824_v18 = vsub.f32 %v43_v4, %v131_v8  ;;  %v140_v20 = vand.u32 4294901760, %v46_v15  ;;  %v2826_v23 = vpack.c.bf16 %v134_v11, %v131_v8  ;;  %v2828_v24 = vsub.f32 %v44_v7, %v134_v11  ;;  %v47_v26 = vld [vmem:[#allocation6 + $0x20] sm:$0xff]  ;;  %v48_v27 = vld [vmem:[#allocation6 + $0x28] sm:$0xff]  ;;  %v65_v41 = vld [vmem:[#allocation6 + $0xb0] sm:$0xff] }
  0x2b   :  { %v2830_v25 = vpack.c.bf16 %v188_v13, %v185_v12  ;;  %2299 = vmatprep.subr.bf16.mxu0 %v2822_v17  ;;  %v2834_v29 = vsub.f32 %v61_v9, %v185_v12  ;;  %v2836_v30 = vsub.f32 %v62_v10, %v188_v13  ;;  %v2840_v32 = vsub.f32 %v45_v14, %v137_v19  ;;  %v66_v46 = vld [vmem:[#allocation6 + $0xb8] sm:$0xff]  ;;  %v49_v59 = vld [vmem:[#allocation6 + $0x30] sm:$0xff]  ;;  %v67_v10 = vld [vmem:[#allocation6 + $0xc0] sm:$0xff] }
  0x2c   :  { %v2838_v31 = vpack.c.bf16 %v140_v20, %v137_v19  ;;  %2301 = vmatpush3.bf16.msra.mxu0 %v2826_v23  ;;  %v191_v33 = vand.u32 4294901760, %v63_v21  ;;  %v194_v34 = vand.u32 4294901760, %v64_v22  ;;  %v2845_v36 = vsub.f32 %v60_v3, %v182_v6  ;;  %v50_v60 = vld [vmem:[#allocation6 + $0x38] sm:$0xff]  ;;  %v68_v11 = vld [vmem:[#allocation6 + $0xc8] sm:$0xff]  ;;  %v51_v19 = vld [vmem:[#allocation6 + $0x40] sm:$0xff] }
  0x2d   :  { %2303 = vmatprep.subr.bf16.mxu0 %v2830_v25  ;;  %v143_v37 = vand.u32 4294901760, %v47_v26  ;;  %v146_v38 = vand.u32 4294901760, %v48_v27  ;;  %v3761_v39 = vand.u32 4294901760, %v2824_v18  ;;  %v3760_v40 = vand.u32 4294901760, %v2828_v24 }
  0x2e   :  { %v2850_v42 = vsub.f32 %v46_v15, %v140_v20  ;;  %v2852_v43 = vpack.c.bf16 %v194_v34, %v191_v33  ;;  %v2854_v44 = vsub.f32 %v63_v21, %v191_v33  ;;  %v3765_v45 = vand.u32 4294901760, %v2843_v35 }
  0x2f   :  { %v2857_v47 = vsub.f32 %v64_v22, %v194_v34  ;;  %v3763_v48 = vand.u32 4294901760, %v2845_v36  ;;  %v2860_v49 = vpack.c.bf16 %v146_v38, %v143_v37  ;;  %v2862_v50 = vsub.f32 %v47_v26, %v143_v37 }
  0x30   :  { %2305 = vmatpush3.bf16.msra.mxu0 %v2838_v31  ;;  %v358_v51 = vsub.f32 %v2843_v35, %v3765_v45  ;;  %v246_v52 = vsub.f32 %v2824_v18, %v3761_v39  ;;  %v253_v53 = vsub.f32 %v2828_v24, %v3760_v40  ;;  %v197_v54 = vand.u32 4294901760, %v65_v41  ;;  %v73_v40 = vld [vmem:[#allocation6 + $0xf0] sm:$0xff]  ;;  %v74_v39 = vld [vmem:[#allocation6 + $0xf8] sm:$0xff] }
  0x31   :  { %2307 = vmatprep.subr.bf16.mxu0 %v2852_v43  ;;  %v365_v55 = vsub.f32 %v2845_v36, %v3763_v48  ;;  %v200_v56 = vand.u32 4294901760, %v66_v46  ;;  %v3758_v57 = vand.u32 4294901760, %v2834_v29  ;;  %v3756_v58 = vand.u32 4294901760, %v2836_v30 }
  0x32   :  { %v359_v61 = vand.u32 4294901760, %v358_v51  ;;  %v2880_v62 = vsub.f32 %v48_v27, %v146_v38  ;;  %v247_v63 = vand.u32 4294901760, %v246_v52  ;;  %v254_v0 = vand.u32 4294901760, %v253_v53  ;;  %v52_v38 = vld [vmem:[#allocation6 + $0x48] sm:$0xff] }
  0x33   :  { %v366_v2 = vand.u32 4294901760, %v365_v55  ;;  %v2882_v3 = vpack.c.bf16 %v200_v56, %v197_v54  ;;  %v2884_v4 = vsub.f32 %v65_v41, %v197_v54  ;;  %v372_v5 = vsub.f32 %v2834_v29, %v3758_v57 }
  0x34   :  { %2309 = vmatpush3.bf16.msra.mxu0 %v2860_v49  ;;  %v2332_v6 = vpack.c.bf16 %v254_v0, %v247_v63  ;;  %v379_v7 = vsub.f32 %v2836_v30, %v3756_v58  ;;  %v149_v8 = vand.u32 4294901760, %v49_v59  ;;  %v152_v9 = vand.u32 4294901760, %v50_v60 }
  0x35   :  { %v2330_v12 = vpack.c.bf16 %v366_v2, %v359_v61  ;;  %2311 = vmatprep.subr.bf16.mxu0 %v2882_v3  ;;  %v373_v13 = vand.u32 4294901760, %v372_v5  ;;  %v3755_v14 = vand.u32 4294901760, %v2840_v32  ;;  %v3753_v15 = vand.u32 4294901760, %v2850_v42  ;;  %v69_v2 = vld [vmem:[#allocation6 + $0xd0] sm:$0xff]  ;;  %v70_v5 = vld [vmem:[#allocation6 + $0xd8] sm:$0xff] }
  0x36   :  { %v2896_v20 = vsub.f32 %v66_v46, %v200_v56  ;;  %v380_v21 = vand.u32 4294901760, %v379_v7  ;;  %v2898_v22 = vpack.c.bf16 %v152_v9, %v149_v8  ;;  %v2900_v26 = vsub.f32 %v49_v59, %v149_v8 }
  0x37   :  { %2331 = vmatprep.subr.bf16.mxu1 %v2330_v12  ;;  %v260_v27 = vsub.f32 %v2840_v32, %v3755_v14  ;;  %v267_v33 = vsub.f32 %v2850_v42, %v3753_v15  ;;  %v203_v34 = vand.u32 4294901760, %v67_v10  ;;  %v206_v37 = vand.u32 4294901760, %v68_v11 }
  0x38   :  { %2333 = vmatpush3.bf16.msra.mxu1 %v2332_v6  ;;  %v2334_v41 = vpack.c.bf16 %v380_v21, %v373_v13  ;;  %2313 = vmatpush3.bf16.msra.mxu0 %v2898_v22  ;;  %v3751_v46 = vand.u32 4294901760, %v2854_v44  ;;  %v3750_v51 = vand.u32 4294901760, %v2857_v47  ;;  %v155_v52 = vand.u32 4294901760, %v51_v19 }
  0x39   :  { %v2911_v53 = vsub.f32 %v50_v60, %v152_v9  ;;  %v261_v54 = vand.u32 4294901760, %v260_v27  ;;  %v268_v55 = vand.u32 4294901760, %v267_v33  ;;  %v2913_v56 = vpack.c.bf16 %v206_v37, %v203_v34  ;;  %v53_v9 = vld [vmem:[#allocation6 + $0x50] sm:$0xff] }
  0x3a   :  { %2335 = vmatprep.subr.bf16.mxu1 %v2334_v41  ;;  %v2915_v59 = vsub.f32 %v67_v10, %v203_v34  ;;  %v386_v61 = vsub.f32 %v2854_v44, %v3751_v46  ;;  %v393_v63 = vsub.f32 %v2857_v47, %v3750_v51  ;;  %v158_v0 = vand.u32 4294901760, %v52_v38  ;;  %v71_v51 = vld [vmem:[#allocation6 + $0xe0] sm:$0xff]  ;;  %v72_v46 = vld [vmem:[#allocation6 + $0xe8] sm:$0xff] }
  0x3b   :  { %v2336_v60 = vpack.c.bf16 %v268_v55, %v261_v54  ;;  %2315 = vmatprep.subr.bf16.mxu0 %v2913_v56  ;;  %v2924_v6 = vsub.f32 %v68_v11, %v206_v37  ;;  %v3748_v7 = vand.u32 4294901760, %v2862_v50  ;;  %v3749_v8 = vand.u32 4294901760, %v2880_v62  ;;  %v54_v37 = vld [vmem:[#allocation6 + $0x58] sm:$0xff] }
  0x3c   :  { %v387_v10 = vand.u32 4294901760, %v386_v61  ;;  %v394_v12 = vand.u32 4294901760, %v393_v63  ;;  %v2928_v13 = vpack.c.bf16 %v158_v0, %v155_v52  ;;  %v2930_v21 = vsub.f32 %v51_v19, %v155_v52 }
  0x3d   :  { %2337 = vmatpush3.bf16.msra.mxu1 %v2336_v60  ;;  %v274_v27 = vsub.f32 %v2862_v50, %v3748_v7  ;;  %v281_v11 = vsub.f32 %v2880_v62, %v3749_v8  ;;  %v209_v33 = vand.u32 4294901760, %v69_v2  ;;  %v212_v34 = vand.u32 4294901760, %v70_v5 }
  0x3e   :  { %v2338_v41 = vpack.c.bf16 %v394_v12, %v387_v10  ;;  %2317 = vmatpush3.bf16.msra.mxu0 %v2928_v13  ;;  %v3752_v54 = vand.u32 4294901760, %v2884_v4  ;;  %v3754_v19 = vand.u32 4294901760, %v2896_v20  ;;  %v161_v52 = vand.u32 4294901760, %v53_v9 }
  0x3f   :  { %v2941_v55 = vsub.f32 %v52_v38, %v158_v0  ;;  %v275_v61 = vand.u32 4294901760, %v274_v27  ;;  %v282_v63 = vand.u32 4294901760, %v281_v11  ;;  %v2943_v60 = vpack.c.bf16 %v212_v34, %v209_v33  ;;  %v55_v11 = vld [vmem:[#allocation6 + $0x60] sm:$0xff] }
  0x40   :  { %2339 = vmatprep.subr.bf16.mxu1 %v2338_v41  ;;  %v2945_v7 = vsub.f32 %v69_v2, %v209_v33  ;;  %v400_v10 = vsub.f32 %v2884_v4, %v3752_v54  ;;  %v407_v12 = vsub.f32 %v2896_v20, %v3754_v19  ;;  %v164_v8 = vand.u32 4294901760, %v54_v37  ;;  %v56_v19 = vld [vmem:[#allocation6 + $0x68] sm:$0xff] }
  0x41   :  { %v2340_v38 = vpack.c.bf16 %v282_v63, %v275_v61  ;;  %2319 = vmatprep.subr.bf16.mxu0 %v2943_v60  ;;  %v2954_v0 = vsub.f32 %v70_v5, %v212_v34  ;;  %v3757_v27 = vand.u32 4294901760, %v2900_v26  ;;  %v3759_v2 = vand.u32 4294901760, %v2911_v53 }
  0x42   :  { %v401_v33 = vand.u32 4294901760, %v400_v10  ;;  %v408_v41 = vand.u32 4294901760, %v407_v12  ;;  %v2958_v54 = vpack.c.bf16 %v164_v8, %v161_v52  ;;  %v2960_v15 = vsub.f32 %v53_v9, %v161_v52 }
  0x43   :  { %2341 = vmatpush3.bf16.msra.mxu1 %v2340_v38  ;;  %v288_v61 = vsub.f32 %v2900_v26, %v3757_v27  ;;  %v295_v5 = vsub.f32 %v2911_v53, %v3759_v2  ;;  %v215_v34 = vand.u32 4294901760, %v71_v51  ;;  %v218_v63 = vand.u32 4294901760, %v72_v46 }
  0x44   :  { %3844 = vst [vmem:[#allocation13_spill] sm:$0xff] %v2958_v54  ;;  %v2342_v14 = vpack.c.bf16 %v408_v41, %v401_v33  ;;  %2321 = vmatpush3.bf16.msra.mxu0 %v2958_v54  ;;  %v3762_v10 = vand.u32 4294901760, %v2915_v59  ;;  %v3764_v9 = vand.u32 4294901760, %v2924_v6  ;;  %v167_v52 = vand.u32 4294901760, %v55_v11 }
  0x45   :  { %v2971_v12 = vsub.f32 %v54_v37, %v164_v8  ;;  %v289_v38 = vand.u32 4294901760, %v288_v61  ;;  %v296_v58 = vand.u32 4294901760, %v295_v5  ;;  %v2973_v27 = vpack.c.bf16 %v218_v63, %v215_v34  ;;  %v57_v61 = vld [vmem:[#allocation6 + $0x70] sm:$0xff] }
  0x46   :  { %2343 = vmatprep.subr.bf16.mxu1 %v2342_v14  ;;  %v2975_v57 = vsub.f32 %v71_v51, %v215_v34  ;;  %v414_v33 = vsub.f32 %v2915_v59, %v3762_v10  ;;  %v421_v41 = vsub.f32 %v2924_v6, %v3764_v9  ;;  %v170_v2 = vand.u32 4294901760, %v56_v19  ;;  %v58_v9 = vld [vmem:[#allocation6 + $0x78] sm:$0xff] }
  0x47   :  { %3845 = vst [vmem:[#allocation14_spill] sm:$0xff] %v2973_v27  ;;  %v2344_v8 = vpack.c.bf16 %v296_v58, %v289_v38  ;;  %2323 = vmatprep.subr.bf16.mxu0 %v2973_v27  ;;  %v2984_v37 = vsub.f32 %v72_v46, %v218_v63  ;;  %v3766_v14 = vand.u32 4294901760, %v2930_v21  ;;  %v3767_v51 = vand.u32 4294901760, %v2941_v55 }
  0x48   :  { %v415_v5 = vand.u32 4294901760, %v414_v33  ;;  %v422_v34 = vand.u32 4294901760, %v421_v41  ;;  %v2988_v10 = vpack.c.bf16 %v170_v2, %v167_v52  ;;  %v2990_v48 = vsub.f32 %v55_v11, %v167_v52 }
  0x49   :  { %2345 = vmatpush3.bf16.msra.mxu1 %v2344_v8  ;;  %v302_v58 = vsub.f32 %v2930_v21, %v3766_v14  ;;  %v309_v46 = vsub.f32 %v2941_v55, %v3767_v51  ;;  %v221_v63 = vand.u32 4294901760, %v73_v40  ;;  %v224_v38 = vand.u32 4294901760, %v74_v39 }
  0x4a   :  { %3846 = vst [vmem:[#allocation15_spill] sm:$0xff] %v2988_v10  ;;  %v2346_v45 = vpack.c.bf16 %v422_v34, %v415_v5  ;;  %2325 = vmatpush3.bf16.msra.mxu0 %v2988_v10  ;;  %v3770_v33 = vand.u32 4294901760, %v2945_v7  ;;  %v3771_v11 = vand.u32 4294901760, %v2954_v0  ;;  %v173_v52 = vand.u32 4294901760, %v57_v61  ;;  %v3013_v10 = vld [vmem:[#allocation3] sm:$0xf] }
  0x4b   :  { %v3001_v41 = vsub.f32 %v56_v19, %v170_v2  ;;  %v303_v8 = vand.u32 4294901760, %v302_v58  ;;  %v310_v28 = vand.u32 4294901760, %v309_v46  ;;  %v3003_v14 = vpack.c.bf16 %v224_v38, %v221_v63  ;;  %3848 = vst [vmem:[#allocation17_spill] sm:$0xff] %v3013_v10 }
  0x4c   :  { %2347 = vmatprep.subr.bf16.mxu1 %v2346_v45  ;;  %v3005_v16 = vsub.f32 %v73_v40, %v221_v63  ;;  %v428_v5 = vsub.f32 %v2945_v7, %v3770_v33  ;;  %v435_v34 = vsub.f32 %v2954_v0, %v3771_v11  ;;  %v176_v51 = vand.u32 4294901760, %v58_v9 }
  0x4d   :  { %3847 = vst [vmem:[#allocation16_spill] sm:$0xff] %v3003_v14  ;;  %v2348_v19 = vpack.c.bf16 %v310_v28, %v303_v8  ;;  %2327 = vmatprep.subr.bf16.mxu0 %v3003_v14  ;;  %v3016_v2 = vsub.f32 %v74_v39, %v224_v38  ;;  %v3772_v45 = vand.u32 4294901760, %v2960_v15  ;;  %v3773_v40 = vand.u32 4294901760, %v2971_v12 }
  0x4e   :  { %v429_v58 = vand.u32 4294901760, %v428_v5  ;;  %v436_v46 = vand.u32 4294901760, %v435_v34  ;;  %v3020_v63 = vpack.c.bf16 %v176_v51, %v173_v52  ;;  %v3022_v33 = vsub.f32 %v57_v61, %v173_v52 }
  0x4f   :  { %2349 = vmatpush3.bf16.msra.mxu1 %v2348_v19  ;;  %v316_v11 = vsub.f32 %v2960_v15, %v3772_v45  ;;  %v323_v28 = vsub.f32 %v2971_v12, %v3773_v40  ;;  %v3850_v39 = vsub.s32 1, %v2819_v1  ;;  %v3782_v8 = vand.u32 4294901760, %v2975_v57 }
  0x50   :  { %3849 = vst [vmem:[#allocation18_spill] sm:$0xff] %v3020_v63  ;;  %v2350_v5 = vpack.c.bf16 %v436_v46, %v429_v58  ;;  %2329 = vmatpush3.bf16.msra.mxu0 %v3020_v63  ;;  %v3783_v61 = vand.u32 4294901760, %v2984_v37  ;;  %v2362_v52 = vpack.c.bf16 %v2845_v36, %v2843_v35  ;;  %v3851_v34 = vsub.s32 0, %v2819_v1 }
  0x51   :  { %v117_v38 = vrot.slane %v3013_v10, %v3850_v39  ;;  %v317_v45 = vand.u32 4294901760, %v316_v11  ;;  %v324_v40 = vand.u32 4294901760, %v323_v28  ;;  %v442_v39 = vsub.f32 %v2975_v57, %v3782_v8 }
  0x52   :  { %v113_v19 = vrot.slane %v3013_v10, %v3851_v34  ;;  %2351 = vmatprep.subr.bf16.mxu1 %v2350_v5  ;;  %v449_v58 = vsub.f32 %v2984_v37, %v3783_v61  ;;  %2363 = vmatprep.subr.bf16.mxu0 %v2362_v52  ;;  %v3784_v1 = vand.u32 4294901760, %v2990_v48  ;;  %v3785_v34 = vand.u32 4294901760, %v3001_v41 }
  0x53   :  { %v3041_v14 = vand.u32 4294901760, %v117_v38  ;;  %v3053_v11 = vsub.f32 %v58_v9, %v176_v51  ;;  %v2352_v28 = vpack.c.bf16 %v324_v40, %v317_v45  ;;  %v443_v63 = vand.u32 4294901760, %v442_v39 }
  0x54   :  { %v3049_v46 = vand.u32 4294901760, %v113_v19  ;;  %v450_v5 = vand.u32 4294901760, %v449_v58  ;;  %v330_v52 = vsub.f32 %v2990_v48, %v3784_v1  ;;  %v337_v9 = vsub.f32 %v3001_v41, %v3785_v34 }
  0x55   :  { %3852 = vst [vmem:[#allocation19_spill] sm:$0xff] %v3041_v14  ;;  %v3056_v10 = vsub.f32 %v117_v38, %v3041_v14  ;;  %467 = vmatprep.mubr.f32.mxu1 %v3041_v14  ;;  %2353 = vmatpush3.bf16.msra.mxu1 %v2352_v28  ;;  %v3790_v45 = vand.u32 4294901760, %v3005_v16  ;;  %v3791_v40 = vand.u32 4294901760, %v3016_v2  ;;  %v343_v34 = vand.u32 4294901760, %v3022_v33 }
  0x56   :  { %v3060_v8 = vsub.f32 %v113_v19, %v3049_v46  ;;  %v2354_v38 = vpack.c.bf16 %v450_v5, %v443_v63  ;;  %v331_v19 = vand.u32 4294901760, %v330_v52  ;;  %v338_v58 = vand.u32 4294901760, %v337_v9 }
  0x57   :  { %v228_v51 = vand.u32 4294901760, %v3056_v10  ;;  %v456_v1 = vsub.f32 %v3005_v16, %v3790_v45  ;;  %v463_v28 = vsub.f32 %v3016_v2, %v3791_v40  ;;  %v2364_v52 = vpack.c.bf16 %v2828_v24, %v2824_v18 }
  0x58   :  { %v3794_v39 = vand.u32 4294901760, %v3060_v8  ;;  %2355 = vmatprep.subr.bf16.mxu1 %v2354_v38  ;;  %v2356_v5 = vpack.c.bf16 %v338_v58, %v331_v19  ;;  %v350_v9 = vand.u32 4294901760, %v3053_v11  ;;  %v344_v40 = vsub.f32 %v3022_v33, %v343_v34 }
  0x59   :  { %v229_v61 = vsub.f32 %v3056_v10, %v228_v51  ;;  %v457_v27 = vand.u32 4294901760, %v456_v1  ;;  %v464_v45 = vand.u32 4294901760, %v463_v28  ;;  %v2366_v38 = vpack.c.bf16 %v2836_v30, %v2834_v29 }
  0x5a   :  { %v235_v63 = vsub.f32 %v3060_v8, %v3794_v39  ;;  %2357 = vmatpush3.bf16.msra.mxu1 %v2356_v5  ;;  %v351_v19 = vsub.f32 %v3053_v11, %v350_v9  ;;  %v345_v39 = vand.u32 4294901760, %v344_v40  ;;  %v2368_v1 = vpack.c.bf16 %v2850_v42, %v2840_v32 }
  0x5b   :  { %v230_v14 = vand.u32 4294901760, %v229_v61  ;;  %v2358_v58 = vpack.c.bf16 %v464_v45, %v457_v27  ;;  %v2372_v5 = vpack.c.bf16 %v2880_v62, %v2862_v50  ;;  %v3853_v27 = vand.u32 4294901760, %v2843_v35 }
  0x5c   :  { %v236_v54 = vand.u32 4294901760, %v235_v63  ;;  %v352_v61 = vand.u32 4294901760, %v351_v19  ;;  %v2370_v63 = vpack.c.bf16 %v2857_v47, %v2854_v44  ;;  %v3855_v45 = vand.u32 4294901760, %v2824_v18 }
  0x5d   :  { %231 = vmatprep.mubr.f32.mxu0 %v230_v14  ;;  %2359 = vmatprep.subr.bf16.mxu1 %v2358_v58  ;;  %v3856_v40 = vand.u32 4294901760, %v2828_v24  ;;  %v3859_v58 = vand.u32 4294901760, %v2840_v32  ;;  %v3861_v35 = vand.u32 4294901760, %v2854_v44  ;;  %v3863_v24 = vand.u32 4294901760, %v2862_v50 }
  0x5e   :  { %237 = vmatmul.mubr.f32.vlgmr.msra.gmra.mrb[0].mxu0 %v236_v54  ;;  %v2360_v28 = vpack.c.bf16 %v352_v61, %v345_v39  ;;  %v3854_v54 = vand.u32 4294901760, %v2845_v36  ;;  %v3857_v39 = vand.u32 4294901760, %v2834_v29  ;;  %v3860_v61 = vand.u32 4294901760, %v2850_v42 }
  0x5f   :  { %2365 = vmatpush3.bf16.msra.mxu0 %v2364_v52  ;;  %604 = vmatprep.mubr.f32.mxu0 %v3056_v10  ;;  %v2428_v52 = vpack.c.bf16 %v3856_v40, %v3855_v45  ;;  %v3862_v36 = vand.u32 4294901760, %v2857_v47  ;;  %v3864_v29 = vand.u32 4294901760, %v2880_v62  ;;  %v3866_v32 = vand.u32 4294901760, %v2896_v20 }
  0x60   :  { %2367 = vmatprep.subr.bf16.mxu0 %v2366_v38  ;;  %v2426_v14 = vpack.c.bf16 %v3854_v54, %v3853_v27  ;;  %v3858_v38 = vand.u32 4294901760, %v2836_v30  ;;  %v3117_v10 = vpack.c.bf16 %v3860_v61, %v3859_v58  ;;  %2361 = vmatpush3.bf16.msra.mxu1 %v2360_v28  ;;  %v3865_v30 = vand.u32 4294901760, %v2884_v4 }
  0x61   :  { %v3123_v18 = vpack.c.bf16 %v3862_v36, %v3861_v35  ;;  %v3129_v27 = vpack.c.bf16 %v3864_v29, %v3863_v24  ;;  %v3867_v28 = vand.u32 4294901760, %v2900_v26  ;;  %v3868_v44 = vand.u32 4294901760, %v2911_v53  ;;  %2395 = vmatprep.subr.bf16.mxu1 %v2822_v17 }
  0x62   :  { %v2430_v19 = vpack.c.bf16 %v3858_v38, %v3857_v39  ;;  %v3135_v42 = vpack.c.bf16 %v3866_v32, %v3865_v30  ;;  %v3869_v47 = vand.u32 4294901760, %v2915_v59  ;;  %v3870_v50 = vand.u32 4294901760, %v2924_v6 }
  0x63   :  { %v3141_v54 = vpack.c.bf16 %v3868_v44, %v3867_v28  ;;  %2369 = vmatpush3.bf16.msra.mxu0 %v2368_v1  ;;  %v3871_v45 = vand.u32 4294901760, %v2930_v21  ;;  %v3872_v40 = vand.u32 4294901760, %v2941_v55  ;;  %v3873_v38 = vand.u32 4294901760, %v2945_v7  ;;  %469 = vmatmul.mubr.f32.vlgmr.msra.gmra.mrb[0].mxu1 %v3049_v46  ;;  %v3883_v44 = vld [vmem:[#allocation19_spill] sm:$0xff] }
  0x64   :  { %v3148_v62 = vpack.c.bf16 %v3870_v50, %v3869_v47  ;;  %v3874_v58 = vand.u32 4294901760, %v2954_v0  ;;  %2371 = vmatprep.subr.bf16.mxu0 %v2370_v63  ;;  %v2374_v1 = vpack.c.bf16 %v2896_v20, %v2884_v4  ;;  %v3875_v35 = vand.u32 4294901760, %v2960_v15  ;;  %2397 = vmatpush3.bf16.msra.mxu1 %v2826_v23 }
  0x65   :  { %v3154_v39 = vpack.c.bf16 %v3872_v40, %v3871_v45  ;;  %v3876_v36 = vand.u32 4294901760, %v2971_v12  ;;  %v3877_v29 = vand.u32 4294901760, %v2990_v48  ;;  %v3878_v30 = vand.u32 4294901760, %v3001_v41  ;;  %711 = vmatprep.mubr.f32.mxu1 %v228_v51  ;;  %2399 = vmatprep.subr.bf16.mxu1 %v2830_v25  ;;  %v93_v40 = vld [vmem:[#allocation6 + $0x190] sm:$0xff] }
  0x66   :  { %v3160_v61 = vpack.c.bf16 %v3874_v58, %v3873_v38  ;;  %v2376_v4 = vpack.c.bf16 %v2911_v53, %v2900_v26  ;;  %v2378_v20 = vpack.c.bf16 %v2924_v6, %v2915_v59  ;;  %v2380_v63 = vpack.c.bf16 %v2941_v55, %v2930_v21  ;;  %v3880_v21 = vld [vmem:[#allocation14_spill] sm:$0xff]  ;;  %v3881_v55 = vld [vmem:[#allocation15_spill] sm:$0xff] }
  0x67   :  { %v3168_v24 = vpack.c.bf16 %v3876_v36, %v3875_v35  ;;  %v3174_v32 = vpack.c.bf16 %v3878_v30, %v3877_v29  ;;  %2373 = vmatpush3.bf16.msra.mxu0 %v2372_v5  ;;  %v2382_v51 = vpack.c.bf16 %v2954_v0, %v2945_v7  ;;  %v2384_v26 = vpack.c.bf16 %v2971_v12, %v2960_v15  ;;  %v3879_v7 = vld [vmem:[#allocation13_spill] sm:$0xff]  ;;  %v75_v12 = vld [vmem:[#allocation6 + $0x100] sm:$0xff]  ;;  %v3884_v38 = vld [vmem:[#allocation18_spill] sm:$0xff] }
  0x68   :  { %2375 = vmatprep.subr.bf16.mxu0 %v2374_v1  ;;  %2401 = vmatpush3.bf16.msra.mxu1 %v2838_v31  ;;  %v2386_v53 = vpack.c.bf16 %v2984_v37, %v2975_v57  ;;  %v2388_v59 = vpack.c.bf16 %v3001_v41, %v2990_v48  ;;  %v2390_v6 = vpack.c.bf16 %v3016_v2, %v3005_v16  ;;  %v91_v48 = vld [vmem:[#allocation6 + $0x180] sm:$0xff]  ;;  %v92_v0 = vld [vmem:[#allocation6 + $0x188] sm:$0xff]  ;;  %v993_v50 = vand.u32 4294901760, %v75_v12  ;;  %v78_v1 = vld [vmem:[#allocation6 + $0x118] sm:$0xff] }
  0x69   :  { %2403 = vmatprep.subr.bf16.mxu1 %v2852_v43  ;;  %v2392_v15 = vpack.c.bf16 %v3053_v11, %v3022_v33  ;;  %v76_v41 = vld [vmem:[#allocation6 + $0x108] sm:$0xff]  ;;  %v1041_v28 = vand.u32 4294901760, %v91_v48  ;;  %v1044_v47 = vand.u32 4294901760, %v92_v0  ;;  %v95_v36 = vld [vmem:[#allocation6 + $0x1a0] sm:$0xff]  ;;  %v3885_v30 = vand.u32 4294901760, %v3060_v8 }
  0x6a   :  { %v3882_v5 = vld [vmem:[#allocation16_spill] sm:$0xff]  ;;  %v996_v45 = vand.u32 4294901760, %v76_v41 }
  0x6b   :  { %2377 = vmatpush3.bf16.msra.mxu0 %v2376_v4  ;;  %v3214_v58 = vsub.f32 %v91_v48, %v1041_v28  ;;  %v96_v29 = vld [vmem:[#allocation6 + $0x1a8] sm:$0xff]  ;;  %v3219_v4 = vsub.f32 %v92_v0, %v1044_v47  ;;  %v97_v0 = vld [vmem:[#allocation6 + $0x1b0] sm:$0xff] }
  0x6c   :  { %2379 = vmatprep.subr.bf16.mxu0 %v2378_v20  ;;  %2405 = vmatpush3.bf16.msra.mxu1 %v2860_v49  ;;  %v3221_v20 = vsub.f32 %v75_v12, %v993_v50  ;;  %v3251_v48 = vpack.c.bf16 %v996_v45, %v993_v50 }
  0x6d   :  { %2407 = vmatprep.subr.bf16.mxu1 %v2882_v3 }
  0x6e   :  { %3890 = vst [vmem:[#allocation13_spill] sm:$0xff] %v3251_v48  ;;  %v3800_v11 = vand.u32 4294901760, %v3221_v20 }
  0x6f   :  { %2381 = vmatpush3.bf16.msra.mxu0 %v2380_v63  ;;  %v3887_v63 = vand.u32 4294901760, %v2984_v37  ;;  %v3806_v37 = vand.u32 4294901760, %v3214_v58 }
  0x70   :  { %2383 = vmatprep.subr.bf16.mxu0 %v2382_v51  ;;  %2409 = vmatpush3.bf16.msra.mxu1 %v2898_v22  ;;  %v3888_v51 = vand.u32 4294901760, %v3005_v16  ;;  %v1056_v16 = vand.u32 4294901760, %v96_v29 }
  0x71   :  { %2411 = vmatprep.subr.bf16.mxu1 %v2913_v56 }
  0x73   :  { %2385 = vmatpush3.bf16.msra.mxu0 %v2384_v26  ;;  %v3889_v26 = vand.u32 4294901760, %v3016_v2  ;;  %v79_v2 = vld [vmem:[#allocation6 + $0x120] sm:$0xff] }
  0x74   :  { %2387 = vmatprep.subr.bf16.mxu0 %v2386_v53  ;;  %2413 = vmatpush3.bf16.msra.mxu1 %v2928_v13 }
  0x75   :  { %2415 = vmatprep.subr.bf16.mxu1 %v2943_v60 }
  0x77   :  { %2389 = vmatpush3.bf16.msra.mxu0 %v2388_v59  ;;  %v1002_v59 = vand.u32 4294901760, %v78_v1 }
  0x78   :  { %2391 = vmatprep.subr.bf16.mxu0 %v2390_v6  ;;  %2417 = vmatpush3.bf16.msra.mxu1 %v3879_v7  ;;  %v80_v6 = vld [vmem:[#allocation6 + $0x128] sm:$0xff] }
  0x79   :  { %2419 = vmatprep.subr.bf16.mxu1 %v3880_v21 }
  0x7b   :  { %2393 = vmatpush3.bf16.msra.mxu0 %v2392_v15  ;;  %v3249_v15 = vpack.c.bf16 %v1044_v47, %v1041_v28  ;;  %v1008_v28 = vand.u32 4294901760, %v80_v6  ;;  %v3269_v47 = vsub.f32 %v78_v1, %v1002_v59 }
  0x7c   :  { %2427 = vmatprep.subr.bf16.mxu0 %v2426_v14  ;;  %2421 = vmatpush3.bf16.msra.mxu1 %v3881_v55  ;;  %v94_v14 = vld [vmem:[#allocation6 + $0x198] sm:$0xff] }
  0x7d   :  { %2423 = vmatprep.subr.bf16.mxu1 %v3882_v5  ;;  %v1050_v35 = vand.u32 4294901760, %v94_v14 }
  0x7e   :  { %607 = vmatmul.mubr.f32.vlgmr.msra.gmra.mrb[2].mxu0 %v3060_v8  ;;  %v3236_v8 = vpack.c.bf16 %v3889_v26, %v3888_v51 }
  0x7f   :  { %2429 = vmatpush3.bf16.msra.mxu0 %v2428_v52  ;;  %881 = vmatprep.mubr.f32.mxu0 %v3883_v44  ;;  %v77_v52 = vld [vmem:[#allocation6 + $0x110] sm:$0xff] }
  0x80   :  { %2431 = vmatprep.subr.bf16.mxu0 %v2430_v19  ;;  %2425 = vmatpush3.bf16.msra.mxu1 %v3884_v38  ;;  %v1047_v19 = vand.u32 4294901760, %v93_v40  ;;  %v999_v53 = vand.u32 4294901760, %v77_v52 }
  0x81   :  { %2459 = vmatprep.subr.bf16.mxu1 %v2822_v17  ;;  %v3886_v17 = vand.u32 4294901760, %v2975_v57  ;;  %v1053_v57 = vand.u32 4294901760, %v95_v36 }
  0x82   :  { %v3257_v33 = vpack.c.bf16 %v1050_v35, %v1047_v19  ;;  %v3265_v12 = vsub.f32 %v77_v52, %v999_v53  ;;  %v3891_v52 = vld [vmem:[#allocation12_spill] sm:$0xff] }
  0x83   :  { %2433 = vmatpush3.bf16.msra.mxu0 %v3117_v10  ;;  %715 = vmatmul.mubr.f32.vlgmr.msra.gmra.mrb[2].mxu1 %v3885_v30  ;;  %v3223_v10 = vsub.f32 %v76_v41, %v996_v45  ;;  %v1005_v41 = vand.u32 4294901760, %v79_v2  ;;  %v3271_v50 = vpack.c.bf16 %v1056_v16, %v1053_v57  ;;  %v1220_v45 = vsub.f32 %v3214_v58, %v3806_v37  ;;  %v85_v37 = vld [vmem:[#allocation6 + $0x150] sm:$0xff] }
  0x84   :  { %2435 = vmatprep.subr.bf16.mxu0 %v3123_v18  ;;  %2461 = vmatpush3.bf16.msra.mxu1 %v2826_v23  ;;  %v3230_v18 = vpack.c.bf16 %v3887_v63, %v3886_v17  ;;  %v3245_v23 = vpack.c.bf16 %v350_v9, %v343_v34  ;;  %v3801_v34 = vand.u32 4294901760, %v3219_v4  ;;  %v3292_v30 = vsub.f32 %v96_v29, %v1056_v16  ;;  %v3893_v63 = vld [vmem:[#allocation17_spill] sm:$0xff] }
  0x85   :  { %985 = vmatprep.mubr.f32.mxu1 %v3883_v44  ;;  %2463 = vmatprep.subr.bf16.mxu1 %v2830_v25  ;;  %v3255_v25 = vsub.f32 %v94_v14, %v1050_v35  ;;  %v3795_v9 = vand.u32 4294901760, %v3223_v10  ;;  %v98_v44 = vld [vmem:[#allocation6 + $0x1b8] sm:$0xff]  ;;  %v3290_v35 = vsub.f32 %v95_v36, %v1053_v57  ;;  %v3294_v17 = vpack.c.bf16 %v1008_v28, %v1005_v41 }
  0x86   :  { %v3299_v26 = vsub.f32 %v79_v2, %v1005_v41  ;;  %v3799_v36 = vand.u32 4294901760, %v3269_v47  ;;  %v1221_v29 = vand.u32 4294901760, %v1220_v45 }
  0x87   :  { %2437 = vmatpush3.bf16.msra.mxu0 %v3129_v27  ;;  %v3253_v27 = vsub.f32 %v93_v40, %v1047_v19  ;;  %v3796_v14 = vand.u32 4294901760, %v3255_v25  ;;  %v124_v19 = vsub.s32 3, %v3891_v52  ;;  %v1115_v1 = vsub.f32 %v3223_v10, %v3795_v9  ;;  %3892 = vst [vmem:[#allocation14_spill] sm:$0xff] %v3294_v17  ;;  %v82_v9 = vld [vmem:[#allocation6 + $0x138] sm:$0xff] }
  0x88   :  { %2439 = vmatprep.subr.bf16.mxu0 %v3135_v42  ;;  %2465 = vmatpush3.bf16.msra.mxu1 %v2838_v31  ;;  %v3263_v42 = vpack.c.bf16 %v1002_v59, %v999_v53  ;;  %v1059_v31 = vand.u32 4294901760, %v97_v0  ;;  %v3301_v53 = vsub.f32 %v80_v6, %v1008_v28  ;;  %v81_v59 = vld [vmem:[#allocation6 + $0x130] sm:$0xff]  ;;  %v1014_v45 = vand.u32 4294901760, %v82_v9 }
  0x89   :  { %2467 = vmatprep.subr.bf16.mxu1 %v2852_v43  ;;  %v3798_v40 = vand.u32 4294901760, %v3253_v27  ;;  %v1227_v43 = vsub.f32 %v3219_v4, %v3801_v34  ;;  %v125_v51 = vrot.slane %v3893_v63, %v124_v19  ;;  %v1116_v6 = vand.u32 4294901760, %v1115_v1  ;;  %v84_v34 = vld [vmem:[#allocation6 + $0x148] sm:$0xff] }
  0x8a   :  { %3894 = vst [vmem:[#allocation15_spill] sm:$0xff] %v3301_v53  ;;  %v3317_v28 = vsub.f32 %v97_v0, %v1059_v31  ;;  %v99_v0 = vld [vmem:[#allocation6 + $0x1c0] sm:$0xff] }
  0x8b   :  { %2441 = vmatpush3.bf16.msra.mxu0 %v3141_v54  ;;  %v1108_v54 = vsub.f32 %v3221_v20, %v3800_v11  ;;  %v1234_v57 = vsub.f32 %v3253_v27, %v3798_v40  ;;  %v1228_v16 = vand.u32 4294901760, %v1227_v43  ;;  %v3805_v40 = vand.u32 4294901760, %v3299_v26 }
  0x8c   :  { %2443 = vmatprep.subr.bf16.mxu0 %v3148_v62  ;;  %v1062_v62 = vand.u32 4294901760, %v98_v44  ;;  %2469 = vmatpush3.bf16.msra.mxu1 %v2860_v49  ;;  %v3797_v49 = vand.u32 4294901760, %v3265_v12 }
  0x8d   :  { %2471 = vmatprep.subr.bf16.mxu1 %v2882_v3  ;;  %v1241_v3 = vsub.f32 %v3255_v25, %v3796_v14  ;;  %v1109_v2 = vand.u32 4294901760, %v1108_v54  ;;  %v3803_v54 = vand.u32 4294901760, %v3290_v35  ;;  %v1235_v1 = vand.u32 4294901760, %v1234_v57 }
  0x8e   :  { %v3314_v41 = vpack.c.bf16 %v1062_v62, %v1059_v31  ;;  %v3324_v14 = vsub.f32 %v98_v44, %v1062_v62  ;;  %v1122_v43 = vsub.f32 %v3265_v12, %v3797_v49  ;;  %v100_v31 = vld [vmem:[#allocation6 + $0x1c8] sm:$0xff]  ;;  %v3336_v62 = vpack.c.bf16 %v1228_v16, %v1221_v29  ;;  %v83_v49 = vld [vmem:[#allocation6 + $0x140] sm:$0xff] }
  0x8f   :  { %2445 = vmatpush3.bf16.msra.mxu0 %v3154_v39  ;;  %v3312_v39 = vand.u32 4294901760, %v125_v51  ;;  %v1065_v57 = vand.u32 4294901760, %v99_v0  ;;  %v3349_v29 = vsub.f32 %v82_v9, %v1014_v45  ;;  %v1136_v9 = vsub.f32 %v3299_v26, %v3805_v40 }
  0x90   :  { %2447 = vmatprep.subr.bf16.mxu0 %v3160_v61  ;;  %3896 = vst [vmem:[#allocation19_spill] sm:$0xff] %v3314_v41  ;;  %2473 = vmatpush3.bf16.msra.mxu1 %v2898_v22  ;;  %v1011_v61 = vand.u32 4294901760, %v81_v59  ;;  %3897 = vst [vmem:[#allocation18_spill] sm:$0xff] %v3324_v14  ;;  %v1129_v22 = vsub.f32 %v3269_v47, %v3799_v36  ;;  %v3804_v36 = vand.u32 4294901760, %v3301_v53  ;;  %v1123_v16 = vand.u32 4294901760, %v1122_v43 }
  0x91   :  { %3895 = vst [vmem:[#allocation16_spill] sm:$0xff] %v3312_v39  ;;  %v3320_v19 = vsub.f32 %v125_v51, %v3312_v39  ;;  %2475 = vmatprep.subr.bf16.mxu1 %v2913_v56  ;;  %v3802_v56 = vand.u32 4294901760, %v3292_v30  ;;  %v3338_v51 = vpack.c.bf16 %v1116_v6, %v1109_v2  ;;  %3900 = vst [vmem:[#allocation20_spill] sm:$0xff] %v3349_v29  ;;  %v1137_v43 = vand.u32 4294901760, %v1136_v9 }
  0x92   :  { %v3343_v11 = vpack.c.bf16 %v1014_v45, %v1011_v61  ;;  %v1130_v2 = vand.u32 4294901760, %v1129_v22  ;;  %v1248_v6 = vsub.f32 %v3290_v35, %v3803_v54  ;;  %v102_v45 = vld [vmem:[#allocation6 + $0x1d8] sm:$0xff]  ;;  %v1020_v54 = vand.u32 4294901760, %v84_v34 }
  0x93   :  { %2449 = vmatpush3.bf16.msra.mxu0 %v3168_v24  ;;  %v1242_v24 = vand.u32 4294901760, %v1241_v3  ;;  %v3807_v44 = vand.u32 4294901760, %v3320_v19  ;;  %v1068_v3 = vand.u32 4294901760, %v100_v31 }
  0x94   :  { %2451 = vmatprep.subr.bf16.mxu0 %v3230_v18  ;;  %2477 = vmatpush3.bf16.msra.mxu1 %v2928_v13  ;;  %3898 = vst [vmem:[#allocation12_spill] sm:$0xff] %v3343_v11  ;;  %v3345_v18 = vsub.f32 %v81_v59, %v1011_v61  ;;  %v1255_v59 = vsub.f32 %v3292_v30, %v3802_v56  ;;  %v1249_v40 = vand.u32 4294901760, %v1248_v6 }
  0x95   :  { %2479 = vmatprep.subr.bf16.mxu1 %v2943_v60  ;;  %v3355_v13 = vpack.c.bf16 %v1242_v24, %v1235_v1  ;;  %v1091_v60 = vsub.f32 %v3320_v19, %v3807_v44  ;;  %v1143_v61 = vsub.f32 %v3301_v53, %v3804_v36  ;;  %v3372_v1 = vpack.c.bf16 %v1068_v3, %v1065_v57 }
  0x96   :  { %3899 = vst [vmem:[#allocation17_spill] sm:$0xff] %v3345_v18  ;;  %v3374_v24 = vsub.f32 %v99_v0, %v1065_v57  ;;  %v3376_v56 = vsub.f32 %v100_v31, %v1068_v3  ;;  %v3380_v36 = vpack.c.bf16 %v1130_v2, %v1123_v16  ;;  %v3812_v44 = vand.u32 4294901760, %v3345_v18  ;;  %v86_v31 = vld [vmem:[#allocation6 + $0x158] sm:$0xff] }
  0x97   :  { %2453 = vmatpush3.bf16.msra.mxu0 %v3174_v32  ;;  %v1017_v32 = vand.u32 4294901760, %v83_v49  ;;  %v1074_v57 = vand.u32 4294901760, %v102_v45  ;;  %v1092_v3 = vand.u32 4294901760, %v1091_v60  ;;  %v1144_v53 = vand.u32 4294901760, %v1143_v61 }
  0x98   :  { %2455 = vmatprep.subr.bf16.mxu0 %v3236_v8  ;;  %v101_v8 = vld [vmem:[#allocation6 + $0x1d0] sm:$0xff]  ;;  %2481 = vmatpush3.bf16.msra.mxu1 %v3879_v7  ;;  %v1256_v7 = vand.u32 4294901760, %v1255_v59  ;;  %v3902_v16 = vand.u32 4294901760, %v3324_v14  ;;  %v3397_v22 = vsub.f32 %v84_v34, %v1020_v54  ;;  %v1023_v60 = vand.u32 4294901760, %v85_v37 }
  0x99   :  { %2483 = vmatprep.subr.bf16.mxu1 %v3880_v21  ;;  %v1071_v0 = vand.u32 4294901760, %v101_v8  ;;  %v3393_v6 = vpack.c.bf16 %v1020_v54, %v1017_v32  ;;  %v3395_v59 = vsub.f32 %v83_v49, %v1017_v32  ;;  %v1026_v9 = vand.u32 4294901760, %v86_v31  ;;  %v3409_v49 = vld [vmem:[#allocation6 + $0x1e8] sm:$0xff] }
  0x9a   :  { %v1269_v2 = vsub.f32 %v3324_v14, %v3902_v16  ;;  %3904 = vst [vmem:[#allocation22_spill] sm:$0xff] %v3397_v22  ;;  %v1150_v61 = vsub.f32 %v3345_v18, %v3812_v44  ;;  %v3407_v16 = vld [vmem:[#allocation6 + $0x1e0] sm:$0xff]  ;;  %v2530_v54 = vpack.c.bf16 %v1256_v7, %v1249_v40  ;;  %v3418_v44 = vpack.c.bf16 %v1144_v53, %v1137_v43 }
  0x9b   :  { %2457 = vmatpush3.bf16.msra.mxu0 %v3245_v23  ;;  %v3901_v23 = vand.u32 4294901760, %v3317_v28  ;;  %3903 = vst [vmem:[#allocation21_spill] sm:$0xff] %v3395_v59  ;;  %v3413_v32 = vpack.c.bf16 %v1074_v57, %v1071_v0  ;;  %v3420_v18 = vsub.f32 %v102_v45, %v1074_v57  ;;  %v3423_v14 = vsub.f32 %v85_v37, %v1023_v60  ;;  %v3427_v7 = vld [vmem:[#allocation6 + $0x160] sm:$0xff] }
  0x9c   :  { %2491 = vmatprep.subr.bf16.mxu0 %v3249_v15  ;;  %2485 = vmatpush3.bf16.msra.mxu1 %v3881_v55  ;;  %v3820_v34 = vand.u32 4294901760, %v3407_v16  ;;  %v3821_v40 = vand.u32 4294901760, %v3409_v49  ;;  %v3432_v53 = vpack.c.bf16 %v1026_v9, %v1023_v60  ;;  %v1151_v45 = vand.u32 4294901760, %v1150_v61 }
  0x9d   :  { %v1262_v21 = vsub.f32 %v3317_v28, %v3901_v23  ;;  %2487 = vmatprep.subr.bf16.mxu1 %v3882_v5  ;;  %v3905_v23 = vand.u32 4294901760, %v3349_v29  ;;  %3906 = vst [vmem:[#allocation23_spill] sm:$0xff] %v3413_v32  ;;  %v3415_v5 = vsub.f32 %v101_v8, %v1071_v0  ;;  %3908 = vst [vmem:[#allocation25_spill] sm:$0xff] %v3420_v18  ;;  %v120_v8 = vsub.s32 2, %v3891_v52  ;;  %v3437_v0 = vld [vmem:[#allocation6 + $0x168] sm:$0xff] }
  0x9e   :  { %883 = vmatmul.mubr.f32.vlgmr.msra.gmra.mrb[4].mxu0 %v3049_v46  ;;  %v3822_v57 = vand.u32 4294901760, %v3395_v59  ;;  %v3451_v61 = vsub.f32 %v86_v31, %v1026_v9 }
  0x9f   :  { %2493 = vmatpush3.bf16.msra.mxu0 %v3251_v48  ;;  %v1157_v55 = vsub.f32 %v3349_v29, %v3905_v23  ;;  %3907 = vst [vmem:[#allocation24_spill] sm:$0xff] %v3415_v5  ;;  %v3819_v48 = vand.u32 4294901760, %v3376_v56  ;;  %1093 = vmatprep.mubr.f32.mxu0 %v1092_v3  ;;  %v1263_v23 = vand.u32 4294901760, %v1262_v21  ;;  %v1270_v29 = vand.u32 4294901760, %v1269_v2  ;;  %v3445_v3 = vld [vmem:[#allocation6 + $0x1f0] sm:$0xff]  ;;  %v3447_v21 = vld [vmem:[#allocation6 + $0x1f8] sm:$0xff] }
  0xa0   :  { %2495 = vmatprep.subr.bf16.mxu0 %v3257_v33  ;;  %2489 = vmatpush3.bf16.msra.mxu1 %v3884_v38  ;;  %v3909_v38 = vand.u32 4294901760, %v3374_v24  ;;  %v3464_v2 = vsub.f32 %v3409_v49, %v3821_v40  ;;  %v3475_v40 = vld [vmem:[#allocation6 + $0x178] sm:$0xff]  ;;  %v3913_v9 = vand.u32 4294901760, %v3447_v21 }
  0xa1   :  { %2523 = vmatprep.subr.bf16.mxu1 %v3336_v62  ;;  %v1158_v43 = vand.u32 4294901760, %v1157_v55  ;;  %v1283_v52 = vsub.f32 %v3376_v56, %v3819_v48  ;;  %v3823_v62 = vand.u32 4294901760, %v3397_v22  ;;  %v2534_v60 = vpack.c.bf16 %v1270_v29, %v1263_v23 }
  0xa2   :  { %v1276_v37 = vsub.f32 %v3374_v24, %v3909_v38  ;;  %v1029_v55 = vand.u32 4294901760, %v3427_v7  ;;  %v3459_v48 = vsub.f32 %v3407_v16, %v3820_v34  ;;  %v121_v29 = vrot.slane %v3893_v63, %v120_v8  ;;  %v3473_v34 = vld [vmem:[#allocation6 + $0x170] sm:$0xff] }
  0xa3   :  { %2497 = vmatpush3.bf16.msra.mxu0 %v3263_v42  ;;  %987 = vmatmul.mubr.f32.vlgmr.msra.gmra.mrb[4].mxu1 %v3049_v46  ;;  %v1032_v46 = vand.u32 4294901760, %v3437_v0  ;;  %v1284_v38 = vand.u32 4294901760, %v1283_v52  ;;  %v1164_v63 = vsub.f32 %v3395_v59, %v3822_v57  ;;  %v3910_v8 = vand.u32 4294901760, %v3415_v5 }
  0xa4   :  { %2499 = vmatprep.subr.bf16.mxu0 %v3271_v50  ;;  %2525 = vmatpush3.bf16.msra.mxu1 %v3338_v51  ;;  %v2536_v51 = vpack.c.bf16 %v1158_v43, %v1151_v45  ;;  %v1277_v31 = vand.u32 4294901760, %v1276_v37  ;;  %v3488_v43 = vsub.f32 %v3427_v7, %v1029_v55  ;;  %v3911_v37 = vand.u32 4294901760, %v3420_v18 }
  0xa5   :  { %1329 = vmatprep.mubr.f32.mxu1 %v3312_v39  ;;  %2527 = vmatprep.subr.bf16.mxu1 %v3355_v13  ;;  %v1171_v13 = vsub.f32 %v3397_v22, %v3823_v62  ;;  %v1290_v45 = vsub.f32 %v3415_v5, %v3910_v8  ;;  %v3497_v57 = vsub.f32 %v3437_v0, %v1032_v46  ;;  %v1035_v62 = vand.u32 4294901760, %v3473_v34 }
  0xa6   :  { %v1297_v23 = vsub.f32 %v3420_v18, %v3911_v37  ;;  %v1038_v8 = vand.u32 4294901760, %v3475_v40  ;;  %v3501_v39 = vand.u32 4294901760, %v121_v29  ;;  %v3912_v7 = vand.u32 4294901760, %v3445_v3 }
  0xa7   :  { %2501 = vmatpush3.bf16.msra.mxu0 %v3294_v17  ;;  %v3840_v0 = vand.u32 4294901760, %v3459_v48  ;;  %v1165_v17 = vand.u32 4294901760, %v1164_v63  ;;  %v3914_v5 = vand.u32 4294901760, %v3423_v14  ;;  %v3915_v22 = vand.u32 4294901760, %v3451_v61 }
  0xa8   :  { %2503 = vmatprep.subr.bf16.mxu0 %v3314_v41  ;;  %2529 = vmatpush3.bf16.msra.mxu1 %v3380_v36  ;;  %v3507_v37 = vsub.f32 %v3445_v3, %v3912_v7  ;;  %v3512_v36 = vsub.f32 %v3447_v21, %v3913_v9  ;;  %v2538_v41 = vpack.c.bf16 %v1284_v38, %v1277_v31  ;;  %v1298_v18 = vand.u32 4294901760, %v1297_v23 }
  0xa9   :  { %2531 = vmatprep.subr.bf16.mxu1 %v2530_v54  ;;  %v1291_v54 = vand.u32 4294901760, %v1290_v45  ;;  %v1178_v7 = vsub.f32 %v3423_v14, %v3914_v5  ;;  %v1185_v9 = vsub.f32 %v3451_v61, %v3915_v22  ;;  %v3526_v52 = vsub.f32 %v3473_v34, %v1035_v62 }
  0xaa   :  { %v3529_v38 = vsub.f32 %v3475_v40, %v1038_v8  ;;  %v3532_v31 = vsub.f32 %v121_v29, %v3501_v39  ;;  %v1304_v22 = vsub.f32 %v3459_v48, %v3840_v0  ;;  %v3917_v29 = vand.u32 4294901760, %v3407_v16 }
  0xab   :  { %2505 = vmatpush3.bf16.msra.mxu0 %v3343_v11  ;;  %v1172_v11 = vand.u32 4294901760, %v1171_v13  ;;  %v3918_v63 = vand.u32 4294901760, %v3409_v49  ;;  %v2542_v0 = vpack.c.bf16 %v1298_v18, %v1291_v54  ;;  %v1179_v23 = vand.u32 4294901760, %v1178_v7 }
  0xac   :  { %2507 = vmatprep.subr.bf16.mxu0 %v3372_v1  ;;  %2533 = vmatpush3.bf16.msra.mxu1 %v3418_v44  ;;  %v3916_v44 = vand.u32 4294901760, %v3464_v2  ;;  %v1186_v59 = vand.u32 4294901760, %v1185_v9  ;;  %v1096_v40 = vand.u32 4294901760, %v3532_v31  ;;  %v1205_v49 = vand.u32 4294901760, %v3526_v52 }
  0xad   :  { %2535 = vmatprep.subr.bf16.mxu1 %v2534_v60  ;;  %v3549_v13 = vpack.c.bf16 %v3918_v63, %v3917_v29  ;;  %v3551_v60 = vpack.c.bf16 %v1032_v46, %v1029_v55  ;;  %v2540_v45 = vpack.c.bf16 %v1172_v11, %v1165_v17  ;;  %v1212_v55 = vand.u32 4294901760, %v3529_v38 }
  0xae   :  { %v1311_v34 = vsub.f32 %v3464_v2, %v3916_v44  ;;  %v3919_v44 = vand.u32 4294901760, %v3488_v43  ;;  %v1305_v11 = vand.u32 4294901760, %v1304_v22  ;;  %v3921_v18 = vand.u32 4294901760, %v3507_v37 }
  0xaf   :  { %2509 = vmatpush3.bf16.msra.mxu0 %v3393_v6  ;;  %v3924_v7 = vand.u32 4294901760, %v3447_v21  ;;  %v2544_v29 = vpack.c.bf16 %v1186_v59, %v1179_v23  ;;  %v1097_v22 = vsub.f32 %v3532_v31, %v1096_v40  ;;  %v1206_v63 = vsub.f32 %v3526_v52, %v1205_v49 }
  0xb0   :  { %2511 = vmatprep.subr.bf16.mxu0 %v3413_v32  ;;  %v1192_v5 = vsub.f32 %v3488_v43, %v3919_v44  ;;  %2537 = vmatpush3.bf16.msra.mxu1 %v2536_v51  ;;  %v3920_v32 = vand.u32 4294901760, %v3497_v57  ;;  %v1312_v17 = vand.u32 4294901760, %v1311_v34  ;;  %v1318_v46 = vsub.f32 %v3507_v37, %v3921_v18 }
  0xb1   :  { %2539 = vmatprep.subr.bf16.mxu1 %v2538_v41  ;;  %v3922_v51 = vand.u32 4294901760, %v3512_v36  ;;  %v3586_v21 = vpack.c.bf16 %v1038_v8, %v1035_v62  ;;  %v1098_v44 = vand.u32 4294901760, %v1097_v22  ;;  %v1207_v18 = vand.u32 4294901760, %v1206_v63  ;;  %v3930_v63 = vld [vmem:[#allocation20_spill] sm:$0xff] }
  0xb2   :  { %v1199_v16 = vsub.f32 %v3497_v57, %v3920_v32  ;;  %v3923_v32 = vand.u32 4294901760, %v3445_v3  ;;  %v1193_v41 = vand.u32 4294901760, %v1192_v5  ;;  %v1213_v3 = vsub.f32 %v3529_v38, %v1212_v55 }
  0xb3   :  { %2513 = vmatpush3.bf16.msra.mxu0 %v3432_v53  ;;  %v1325_v54 = vsub.f32 %v3512_v36, %v3922_v51  ;;  %v2546_v59 = vpack.c.bf16 %v1312_v17, %v1305_v11  ;;  %v1319_v23 = vand.u32 4294901760, %v1318_v46  ;;  %v2556_v62 = vpack.c.bf16 %v3223_v10, %v3221_v20 }
  0xb4   :  { %2515 = vmatprep.subr.bf16.mxu0 %v3549_v13  ;;  %v3574_v9 = vpack.c.bf16 %v3924_v7, %v3923_v32  ;;  %2541 = vmatpush3.bf16.msra.mxu1 %v2540_v45  ;;  %v1200_v34 = vand.u32 4294901760, %v1199_v16  ;;  %v2554_v45 = vpack.c.bf16 %v3219_v4, %v3214_v58  ;;  %v1214_v51 = vand.u32 4294901760, %v1213_v3  ;;  %v3926_v7 = vld [vmem:[#allocation18_spill] sm:$0xff] }
  0xb5   :  { %2543 = vmatprep.subr.bf16.mxu1 %v2542_v0  ;;  %v1326_v5 = vand.u32 4294901760, %v1325_v54  ;;  %v2558_v0 = vpack.c.bf16 %v3255_v25, %v3253_v27  ;;  %v2560_v17 = vpack.c.bf16 %v3269_v47, %v3265_v12  ;;  %v2562_v46 = vpack.c.bf16 %v3292_v30, %v3290_v35  ;;  %v3925_v54 = vld [vmem:[#allocation15_spill] sm:$0xff] }
  0xb6   :  { %v2548_v16 = vpack.c.bf16 %v1200_v34, %v1193_v41  ;;  %v2552_v11 = vpack.c.bf16 %v1214_v51, %v1207_v18  ;;  %v2564_v32 = vpack.c.bf16 %v3925_v54, %v3299_v26  ;;  %v3927_v41 = vld [vmem:[#allocation13_spill] sm:$0xff]  ;;  %v3928_v22 = vand.u32 4294901760, %v3320_v19  ;;  %v3935_v18 = vld [vmem:[#allocation14_spill] sm:$0xff]  ;;  %v3936_v51 = vld [vmem:[#allocation19_spill] sm:$0xff] }
  0xb7   :  { %2517 = vmatpush3.bf16.msra.mxu0 %v3551_v60  ;;  %v2550_v8 = vpack.c.bf16 %v1326_v5, %v1319_v23  ;;  %v3929_v34 = vld [vmem:[#allocation17_spill] sm:$0xff]  ;;  %v3932_v5 = vld [vmem:[#allocation22_spill] sm:$0xff] }
  0xb8   :  { %2519 = vmatprep.subr.bf16.mxu0 %v3574_v9  ;;  %2545 = vmatpush3.bf16.msra.mxu1 %v2544_v29  ;;  %v2566_v29 = vpack.c.bf16 %v3926_v7, %v3317_v28  ;;  %v2568_v3 = vpack.c.bf16 %v3930_v63, %v3929_v34  ;;  %v3931_v23 = vld [vmem:[#allocation21_spill] sm:$0xff] }
  0xb9   :  { %2547 = vmatprep.subr.bf16.mxu1 %v2546_v59  ;;  %v2570_v59 = vpack.c.bf16 %v3376_v56, %v3374_v24 }
  0xbb   :  { %2521 = vmatpush3.bf16.msra.mxu0 %v3586_v21 }
  0xbc   :  { %2555 = vmatprep.subr.bf16.mxu0 %v2554_v45  ;;  %2549 = vmatpush3.bf16.msra.mxu1 %v2548_v16  ;;  %v2572_v45 = vpack.c.bf16 %v3932_v5, %v3931_v23 }
  0xbd   :  { %2551 = vmatprep.subr.bf16.mxu1 %v2550_v8  ;;  %v2578_v8 = vpack.c.bf16 %v3464_v2, %v3459_v48 }
  0xbe   :  { %1099 = vmatmul.mubr.f32.vlgmr.msra.gmra.mrb[6].mxu0 %v1098_v44  ;;  %v3934_v44 = vld [vmem:[#allocation25_spill] sm:$0xff] }
  0xbf   :  { %2557 = vmatpush3.bf16.msra.mxu0 %v2556_v62  ;;  %1466 = vmatprep.mubr.f32.mxu0 %v3320_v19  ;;  %v3933_v19 = vld [vmem:[#allocation24_spill] sm:$0xff]  ;;  %v2576_v62 = vpack.c.bf16 %v3451_v61, %v3423_v14 }
  0xc0   :  { %2559 = vmatprep.subr.bf16.mxu0 %v2558_v0  ;;  %2553 = vmatpush3.bf16.msra.mxu1 %v2552_v11  ;;  %v2574_v16 = vpack.c.bf16 %v3934_v44, %v3933_v19  ;;  %v3937_v0 = vld [vmem:[#allocation12_spill] sm:$0xff]  ;;  %v2580_v11 = vpack.c.bf16 %v3497_v57, %v3488_v43 }
  0xc1   :  { %2587 = vmatprep.subr.bf16.mxu1 %v3249_v15 }
  0xc3   :  { %2561 = vmatpush3.bf16.msra.mxu0 %v2560_v17  ;;  %1331 = vmatmul.mubr.f32.vlgmr.msra.gmra.mrb[6].mxu1 %v3501_v39  ;;  %v2582_v17 = vpack.c.bf16 %v3512_v36, %v3507_v37 }
  0xc4   :  { %2563 = vmatprep.subr.bf16.mxu0 %v2562_v46  ;;  %2589 = vmatpush3.bf16.msra.mxu1 %v3927_v41  ;;  %v3938_v46 = vld [vmem:[#allocation23_spill] sm:$0xff] }
  0xc5   :  { %1573 = vmatprep.mubr.f32.mxu1 %v3928_v22  ;;  %2591 = vmatprep.subr.bf16.mxu1 %v3257_v33  ;;  %v3940_v22 = vand.u32 4294901760, %v3219_v4  ;;  %v3946_v4 = vand.u32 4294901760, %v3269_v47  ;;  %v3952_v47 = vand.u32 4294901760, %v3317_v28  ;;  %v3956_v28 = vand.u32 4294901760, %v3374_v24 }
  0xc6   :  { %v3964_v24 = vand.u32 4294901760, %v3459_v48  ;;  %v2648_v48 = vpack.c.bf16 %v1212_v55, %v1205_v49 }
  0xc7   :  { %2565 = vmatpush3.bf16.msra.mxu0 %v2564_v32  ;;  %v2584_v32 = vpack.c.bf16 %v3529_v38, %v3526_v52 }
  0xc8   :  { %2567 = vmatprep.subr.bf16.mxu0 %v2566_v29  ;;  %2593 = vmatpush3.bf16.msra.mxu1 %v3263_v42  ;;  %v3939_v29 = vand.u32 4294901760, %v3214_v58  ;;  %v3945_v58 = vand.u32 4294901760, %v3265_v12  ;;  %v3951_v12 = vand.u32 4294901760, %v3925_v54  ;;  %v3957_v54 = vand.u32 4294901760, %v3376_v56 }
  0xc9   :  { %2595 = vmatprep.subr.bf16.mxu1 %v3271_v50 }
  0xcb   :  { %2569 = vmatpush3.bf16.msra.mxu0 %v2568_v3  ;;  %v2618_v3 = vpack.c.bf16 %v3940_v22, %v3939_v29 }
  0xcc   :  { %2571 = vmatprep.subr.bf16.mxu0 %v2570_v59  ;;  %2597 = vmatpush3.bf16.msra.mxu1 %v3935_v18  ;;  %v3941_v59 = vand.u32 4294901760, %v3221_v20  ;;  %v2624_v20 = vpack.c.bf16 %v3946_v4, %v3945_v58 }
  0xcd   :  { %2599 = vmatprep.subr.bf16.mxu1 %v3936_v51 }
  0xcf   :  { %2573 = vmatpush3.bf16.msra.mxu0 %v2572_v45  ;;  %v3942_v45 = vand.u32 4294901760, %v3223_v10  ;;  %v3947_v10 = vand.u32 4294901760, %v3290_v35  ;;  %v3953_v35 = vand.u32 4294901760, %v3926_v7  ;;  %v2634_v7 = vpack.c.bf16 %v3957_v54, %v3956_v28 }
  0xd0   :  { %2575 = vmatprep.subr.bf16.mxu0 %v2574_v16  ;;  %2601 = vmatpush3.bf16.msra.mxu1 %v3937_v0 }
  0xd1   :  { %2603 = vmatprep.subr.bf16.mxu1 %v3372_v1  ;;  %v2620_v16 = vpack.c.bf16 %v3942_v45, %v3941_v59  ;;  %v2630_v22 = vpack.c.bf16 %v3953_v35, %v3952_v47 }
  0xd3   :  { %2577 = vmatpush3.bf16.msra.mxu0 %v2576_v62  ;;  %v3943_v62 = vand.u32 4294901760, %v3253_v27  ;;  %v3948_v27 = vand.u32 4294901760, %v3292_v30  ;;  %v3955_v30 = vand.u32 4294901760, %v3930_v63 }
  0xd4   :  { %2579 = vmatprep.subr.bf16.mxu0 %v2578_v8  ;;  %2605 = vmatpush3.bf16.msra.mxu1 %v3393_v6  ;;  %v3944_v8 = vand.u32 4294901760, %v3255_v25  ;;  %v3949_v25 = vld [vmem:[#allocation16_spill] sm:$0xff] }
  0xd5   :  { %2607 = vmatprep.subr.bf16.mxu1 %v3938_v46 }
  0xd7   :  { %2581 = vmatpush3.bf16.msra.mxu0 %v2580_v11  ;;  %v2622_v11 = vpack.c.bf16 %v3944_v8, %v3943_v62 }
  0xd8   :  { %2583 = vmatprep.subr.bf16.mxu0 %v2582_v17  ;;  %2609 = vmatpush3.bf16.msra.mxu1 %v3432_v53  ;;  %v2626_v17 = vpack.c.bf16 %v3948_v27, %v3947_v10 }
  0xd9   :  { %2611 = vmatprep.subr.bf16.mxu1 %v3549_v13 }
  0xdb   :  { %2585 = vmatpush3.bf16.msra.mxu0 %v2584_v32  ;;  %v3950_v32 = vand.u32 4294901760, %v3299_v26 }
  0xdc   :  { %2619 = vmatprep.subr.bf16.mxu0 %v2618_v3  ;;  %2613 = vmatpush3.bf16.msra.mxu1 %v3551_v60 }
  0xdd   :  { %2615 = vmatprep.subr.bf16.mxu1 %v3574_v9  ;;  %v2628_v29 = vpack.c.bf16 %v3951_v12, %v3950_v32 }
  0xde   :  { %1469 = vmatmul.mubr.f32.vlgmr.msra.gmra.mrb[8].mxu0 %v3532_v31  ;;  %v3958_v31 = vand.u32 4294901760, %v3931_v23  ;;  %v3965_v23 = vand.u32 4294901760, %v3464_v2 }
  0xdf   :  { %2621 = vmatpush3.bf16.msra.mxu0 %v2620_v16  ;;  %1743 = vmatprep.mubr.f32.mxu0 %v3949_v25 }
  0xe0   :  { %2623 = vmatprep.subr.bf16.mxu0 %v2622_v11  ;;  %2617 = vmatpush3.bf16.msra.mxu1 %v3586_v21 }
  0xe1   :  { %2651 = vmatprep.subr.bf16.mxu1 %v3249_v15  ;;  %v3954_v15 = vand.u32 4294901760, %v3929_v34  ;;  %v3961_v34 = vand.u32 4294901760, %v3934_v44  ;;  %v3967_v44 = vand.u32 4294901760, %v3497_v57 }
  0xe3   :  { %2625 = vmatpush3.bf16.msra.mxu0 %v2624_v20  ;;  %1577 = vmatmul.mubr.f32.vlgmr.msra.gmra.mrb[8].mxu1 %v1096_v40  ;;  %v2632_v26 = vpack.c.bf16 %v3955_v30, %v3954_v15 }
  0xe4   :  { %2627 = vmatprep.subr.bf16.mxu0 %v2626_v17  ;;  %2653 = vmatpush3.bf16.msra.mxu1 %v3927_v41  ;;  %v3960_v41 = vand.u32 4294901760, %v3933_v19  ;;  %v3966_v19 = vand.u32 4294901760, %v3488_v43 }
  0xe5   :  { %1847 = vmatprep.mubr.f32.mxu1 %v3949_v25  ;;  %2655 = vmatprep.subr.bf16.mxu1 %v3257_v33  ;;  %v3959_v33 = vand.u32 4294901760, %v3932_v5  ;;  %v2642_v5 = vpack.c.bf16 %v3965_v23, %v3964_v24 }
  0xe6   :  { %v2638_v63 = vpack.c.bf16 %v3961_v34, %v3960_v41 }
  0xe7   :  { %2629 = vmatpush3.bf16.msra.mxu0 %v2628_v29  ;;  %v2636_v40 = vpack.c.bf16 %v3959_v33, %v3958_v31 }
  0xe8   :  { %2631 = vmatprep.subr.bf16.mxu0 %v2630_v22  ;;  %2657 = vmatpush3.bf16.msra.mxu1 %v3263_v42  ;;  %v3962_v42 = vand.u32 4294901760, %v3423_v14  ;;  %v3968_v14 = vand.u32 4294901760, %v3507_v37 }
  0xe9   :  { %2659 = vmatprep.subr.bf16.mxu1 %v3271_v50  ;;  %v3963_v50 = vand.u32 4294901760, %v3451_v61  ;;  %v3969_v61 = vand.u32 4294901760, %v3512_v36 }
  0xeb   :  { %2633 = vmatpush3.bf16.msra.mxu0 %v2632_v26  ;;  %v2640_v56 = vpack.c.bf16 %v3963_v50, %v3962_v42 }
  0xec   :  { %2635 = vmatprep.subr.bf16.mxu0 %v2634_v7  ;;  %2661 = vmatpush3.bf16.msra.mxu1 %v3935_v18  ;;  %v2644_v18 = vpack.c.bf16 %v3967_v44, %v3966_v19 }
  0xed   :  { %2663 = vmatprep.subr.bf16.mxu1 %v3936_v51  ;;  %v2646_v51 = vpack.c.bf16 %v3969_v61, %v3968_v14 }
  0xef   :  { %2637 = vmatpush3.bf16.msra.mxu0 %v2636_v40 }
  0xf0   :  { %2639 = vmatprep.subr.bf16.mxu0 %v2638_v63  ;;  %2665 = vmatpush3.bf16.msra.mxu1 %v3937_v0 }
  0xf1   :  { %2667 = vmatprep.subr.bf16.mxu1 %v3372_v1 }
  0xf3   :  { %2641 = vmatpush3.bf16.msra.mxu0 %v2640_v56 }
  0xf4   :  { %2643 = vmatprep.subr.bf16.mxu0 %v2642_v5  ;;  %2669 = vmatpush3.bf16.msra.mxu1 %v3393_v6 }
  0xf5   :  { %2671 = vmatprep.subr.bf16.mxu1 %v3938_v46 }
  0xf7   :  { %2645 = vmatpush3.bf16.msra.mxu0 %v2644_v18 }
  0xf8   :  { %2647 = vmatprep.subr.bf16.mxu0 %v2646_v51  ;;  %2673 = vmatpush3.bf16.msra.mxu1 %v3432_v53  ;;  %v108_v53 = vstv %s3746_s2  ;;  %s2767_s2 = smov [#allocation8]  }
  0xf9   :  { %2675 = vmatprep.subr.bf16.mxu1 %v3549_v13  ;;  %s1867_s11 = sshll.u32 %s2767_s2, 4  ;;  %s1868_s11 = int_to_ptr.vmem [resolvable:$true] %s1867_s11 }
  0xfa   :  { %s2735_s12 = scalar_lea.vmem %s1868_s11, 16  ;;  %s2739_s13 = scalar_lea.vmem %s1868_s11, 32 }
  0xfb   :  { %2649 = vmatpush3.bf16.msra.mxu0 %v2648_v48  ;;  %p2736_p2 = scmp.ne.s32.totalorder %s1868_s11, %s2735_s12  ;;  %p2740_p3 = scmp.lt.s32.totalorder %s1868_s11, %s1868_s11 }
  0xfc   :  { %2677 = vmatpush3.bf16.msra.mxu1 %v3551_v60  ;;  %p2741_p4 = scmp.lt.s32.totalorder %s2739_s13, %s2735_s12 }
  0xfd   :  { %2679 = vmatprep.subr.bf16.mxu1 %v3574_v9 }
  0xfe   :  { %1745 = vmatmul.mubr.f32.vlgmr.msra.gmra.mrb[10].mxu0 %v3501_v39  ;;  %p2742_p5 = por %p2741_p4, %p2740_p3 }
 0x100   :  { %2681 = vmatpush3.bf16.msra.mxu1 %v3586_v21  ;;  %p2743_p6 = pnand %p2742_p5, %p2736_p2 }
 0x103   :  { %1849 = vmatmul.mubr.f32.vlgmr.msra.gmra.mrb[10].mxu1 %v3501_v39 }
 0x131   :  { %v1910_v1 = vpop.f32.mrb[0].mxu0 }
 0x132   :  { %v1911_v6 = vpop.f32.mrb[1].mxu0 }
 0x133   :  { %v1912_v57 = vadd.f32 %v1911_v6, %v1910_v1 }
 0x135   :  { %v239_v2 = vadd.f32 %v1912_v57, %v108_v53 }
 0x136   :  { %v1945_v43 = vpop.f32.mrb[0].mxu1 }
 0x137   :  { %v1946_v52 = vpop.f32.mrb[1].mxu1 }
 0x138   :  { %v1947_v37 = vadd.f32 %v1946_v52, %v1945_v43 }
 0x13a   :  { %v471_v36 = vadd.f32 %v1947_v37, %v239_v2 }
 0x151   :  { %v1980_v38 = vpop.f32.mrb[2].mxu0 }
 0x152   :  { %v1981_v13 = vpop.f32.mrb[3].mxu0 }
 0x153   :  { %v1982_v60 = vadd.f32 %v1981_v13, %v1980_v38 }
 0x155   :  { %v609_v49 = vadd.f32 %v1982_v60, %v471_v36 }
 0x156   :  { %v2015_v55 = vpop.f32.mrb[2].mxu1 }
 0x157   :  { %v2016_v9 = vpop.f32.mrb[3].mxu1 }
 0x158   :  { %v2017_v21 = vadd.f32 %v2016_v9, %v2015_v55 }
 0x15a   :  { %v717_v39 = vadd.f32 %v2017_v21, %v609_v49 }
 0x171   :  { %v2050_v0 = vpop.f32.mrb[4].mxu0 }
 0x172   :  { %v2051_v46 = vpop.f32.mrb[5].mxu0 }
 0x173   :  { %v2052_v3 = vadd.f32 %v2051_v46, %v2050_v0 }
 0x175   :  { %v885_v59 = vadd.f32 %v2052_v3, %v717_v39 }
 0x176   :  { %v2085_v45 = vpop.f32.mrb[4].mxu1 }
 0x177   :  { %v2086_v16 = vpop.f32.mrb[5].mxu1 }
 0x178   :  { %v2087_v62 = vadd.f32 %v2086_v16, %v2085_v45 }
 0x17a   :  { %v989_v8 = vadd.f32 %v2087_v62, %v885_v59 }
 0x191   :  { %v2120_v11 = vpop.f32.mrb[6].mxu0 }
 0x192   :  { %v2121_v58 = vpop.f32.mrb[7].mxu0 }
 0x193   :  { %v2122_v4 = vadd.f32 %v2121_v58, %v2120_v11 }
 0x195   :  { %v1101_v20 = vadd.f32 %v2122_v4, %v989_v8 }
 0x196   :  { %v2155_v10 = vpop.f32.mrb[6].mxu1 }
 0x197   :  { %v2156_v27 = vpop.f32.mrb[7].mxu1 }
 0x198   :  { %v2157_v17 = vadd.f32 %v2156_v27, %v2155_v10 }
 0x19a   :  { %v1333_v25 = vadd.f32 %v2157_v17, %v1101_v20 }
 0x1b1   :  { %v2190_v32 = vpop.f32.mrb[8].mxu0 }
 0x1b2   :  { %v2191_v12 = vpop.f32.mrb[9].mxu0 }
 0x1b3   :  { %v2192_v29 = vadd.f32 %v2191_v12, %v2190_v32 }
 0x1b5   :  { %v1471_v47 = vadd.f32 %v2192_v29, %v1333_v25 }
 0x1b6   :  { %v2225_v35 = vpop.f32.mrb[8].mxu1 }
 0x1b7   :  { %v2226_v22 = vpop.f32.mrb[9].mxu1 }
 0x1b8   :  { %v2227_v15 = vadd.f32 %v2226_v22, %v2225_v35 }
 0x1ba   :  { %v1579_v30 = vadd.f32 %v2227_v15, %v1471_v47 }
 0x1d1   :  { %v2260_v26 = vpop.f32.mrb[10].mxu0 }
 0x1d2   :  { %v2261_v28 = vpop.f32.mrb[11].mxu0 }
 0x1d3   :  { %v2262_v54 = vadd.f32 %v2261_v28, %v2260_v26 }
 0x1d5   :  { %v1747_v7 = vadd.f32 %v2262_v54, %v1579_v30 }
 0x1d6   :  { %v2295_v31 = vpop.f32.mrb[10].mxu1 }
 0x1d7   :  { %v2296_v33 = vpop.f32.mrb[11].mxu1 }
 0x1d8   :  { %v2297_v40 = vadd.f32 %v2296_v33, %v2295_v31 }
 0x1da   :  { %v1851_v41 = vadd.f32 %v2297_v40, %v1747_v7 }
 0x1dc   :  { %v1877_v34 = vmul.f32 -1.442695, %v1851_v41 }
 0x1de   :  { %2687 = vpow2.f32 %v1877_v34 }
 0x1e8   :  { %v2688_v63 = vpop.eup %2687 }
 0x1e9   :  { %v1857_v42 = vadd.f32 1.0, %v2688_v63 }
 0x1eb   :  { %2689 = vrcp.f32 %v1857_v42 }
 0x1f5   :  { %v2690_v50 = vpop.eup %2689 }
 0x1f6   :  { %1860 = vst [vmem:[#allocation8] sm:$0x1] %v2690_v50 }
 0x1f7   :  { %2746 = shalt.err (!%p2743_p6)
}
 0x1f8   :  { %s2747_s16 = scalar_lea.hbm %s3747_s3, 16 }
 0x1f9   :  { %p2748_p7 = scmp.ne.s32.totalorder %s3747_s3, %s2747_s16  ;;  %p2751_p8 = scmp.lt.u32.totalorder %s2747_s16, %s3747_s3 }
 0x1fb   :  { %p2753_p9 = pnand %p2751_p8, %p2748_p7 }
 0x1fd   :  { %2756 = shalt.err (!%p2753_p9)
}
 0x1fe   :  { %1870 = dma.vmem_to_hbm [thread:$0]  %s1868_s11, 16, %s3747_s3, [#allocation5]  }
 0x1ff   :  { %2761 = dma.done.wait [#allocation5], 16  }
 0x200   :  { %2762 = vsyncadd [#allocation5], 4294967280 }
 0x201   :  { %1874 = vsyncpa [#allocation4], 1 }
 0x202   :  { %1875 = vsyncpa [#allocation7], 1 }
 0x203   :  { %1876 = vsyncpa [#allocation5], 1 }

</bundles_post_ra>
